<compile_context>
chip_gen: v6e
topology: v6e:2x2x1
jax: 0.10.0
libtpu: 0.0.40
codegen_flags: <defaults>
</compile_context>

<pallas_src>
import functools
import math

import numpy as np
import jax
import jax.numpy as jnp
from jax.experimental import pallas as pl
from jax.experimental.pallas import tpu as pltpu

# Set to jnp.bfloat16 on v6e/v7x to halve matmul-input HBM bytes (epilogue stays f32).
_MATMUL_DTYPE = jnp.float32
_LN_EPS = 1e-5


# ----------------------------------------------------------------------------
# Pallas kernels.  All operate on (C, M) tiles: channels on sublanes, pixels on lanes.
# ----------------------------------------------------------------------------
def _mm_bias_act_kernel(w_ref, b_ref, x_ref, o_ref, *, relu):
    acc = jnp.dot(w_ref[...], x_ref[...], preferred_element_type=jnp.float32)
    acc = acc + b_ref[...]
    if relu:
        acc = jnp.maximum(acc, 0.0)
    o_ref[...] = acc.astype(o_ref.dtype)


def _mm_bias_act_ln_kernel(w_ref, b_ref, g_ref, bt_ref, avg_ref, x_ref, o_ref, *,
                           relu, eps):
    acc = jnp.dot(w_ref[...], x_ref[...], preferred_element_type=jnp.float32)
    acc = acc + b_ref[...]
    if relu:
        acc = jnp.maximum(acc, 0.0)
    # Per-pixel LayerNorm over channel groups: the sublane-axis reductions are expressed as
    # tiny MXU matmuls with a precomputed block-diagonal averaging matrix.
    mu = jnp.dot(avg_ref[...], acc, preferred_element_type=jnp.float32)
    d = acc - mu
    var = jnp.dot(avg_ref[...], d * d, preferred_element_type=jnp.float32)
    y = d * jax.lax.rsqrt(var + eps)
    o_ref[...] = (y * g_ref[...] + bt_ref[...]).astype(o_ref.dtype)


def _conv3_agg_kernel(w1_ref, b1_ref, wz_ref, wx_ref, b2_ref, p_ref, x_ref, o_ref):
    # TransformBlock tail: z3 = relu(conv3x3(z2)); out = Wz@z3 + Wx@x + b  (concat-free 1x1).
    t = jnp.dot(w1_ref[...], p_ref[...], preferred_element_type=jnp.float32) + b1_ref[...]
    t = jnp.maximum(t, 0.0)
    acc = jnp.dot(wz_ref[...], t.astype(wz_ref.dtype), preferred_element_type=jnp.float32)
    acc = acc + jnp.dot(wx_ref[...], x_ref[...], preferred_element_type=jnp.float32)
    o_ref[...] = (acc + b2_ref[...]).astype(o_ref.dtype)


def _conv_ln_conv_kernel(w1_ref, b1_ref, g_ref, bt_ref, avg_ref, w2_ref, b2_ref,
                         p_ref, o_ref, *, eps):
    # Head tail: h = LN(relu(conv3x3(x))); out = conv1x1(h), all in one kernel.
    acc = jnp.dot(w1_ref[...], p_ref[...], preferred_element_type=jnp.float32) + b1_ref[...]
    acc = jnp.maximum(acc, 0.0)
    mu = jnp.dot(avg_ref[...], acc, preferred_element_type=jnp.float32)
    d = acc - mu
    var = jnp.dot(avg_ref[...], d * d, preferred_element_type=jnp.float32)
    y = d * jax.lax.rsqrt(var + eps) * g_ref[...] + bt_ref[...]
    acc2 = jnp.dot(w2_ref[...], y.astype(w2_ref.dtype), preferred_element_type=jnp.float32)
    o_ref[...] = (acc2 + b2_ref[...]).astype(o_ref.dtype)


# ----------------------------------------------------------------------------
# Tiling helpers / pallas_call wrappers
# ----------------------------------------------------------------------------
def _round_up(v, m):
    return ((v + m - 1) // m) * m


def _choose_m_tile(mp, k):
    """Lane-tile: big enough to amortize ~0.35us/step, small enough for VMEM, and giving
    >=2 grid steps (megacore) whenever possible."""
    budget = 4 * 1024 * 1024  # bytes for one buffered (K, tm) f32 input block
    for t in (1024, 512, 256, 128):
        if mp % t == 0 and mp // t >= 2 and t * max(k, 8) * 4 <= budget:
            return t
    return mp if mp <= 1024 else 128


def _compiler_params():
    return pltpu.CompilerParams(dimension_semantics=("parallel",),
                                vmem_limit_bytes=32 * 1024 * 1024)


def _group_avg(c_total, groups):
    """Block-diagonal group-averaging matrix (host-side constant)."""
    cg = c_total // groups
    idx = np.arange(c_total) // cg
    avg = (idx[:, None] == idx[None, :]).astype(np.float32) / float(cg)
    return jnp.asarray(avg)


def _im2col(x, kh, kw, stride, pad):
    """x: (Cin, N, H, W) -> patches (KH*KW*Cin, M), tap-major k layout. Returns hout, wout."""
    c, n, h, w = x.shape
    hout = (h + 2 * pad - kh) // stride + 1
    wout = (w + 2 * pad - kw) // stride + 1
    m = n * hout * wout
    if kh == 1 and kw == 1 and stride == 1 and pad == 0:
        return x.reshape(c, m), hout, wout
    # TODO(synk): replace this HBM-materialized im2col (KH*KW tap copies) with an in-kernel
    # halo DMA of a spatially padded tile to cut input traffic ~KH*KW x.
    xp = jnp.pad(x, ((0, 0), (0, 0), (pad, pad), (pad, pad)))
    taps = []
    for dh in range(kh):
        for dw in range(kw):
            sl = jax.lax.slice(
                xp, (0, 0, dh, dw),
                (c, n, dh + (hout - 1) * stride + 1, dw + (wout - 1) * stride + 1),
                (1, 1, stride, stride))
            taps.append(sl.reshape(c, m))
    return jnp.concatenate(taps, axis=0), hout, wout


def mm_bias_act(wk, bias, patches, *, relu=False, ln=None, ln_groups=1):
    """out(Cout, M) = wk(Cout, K) @ patches(K, M) + bias, optional ReLU and LayerNorm over
    channel groups, fused into one Pallas kernel."""
    cout, k = wk.shape
    _, m = patches.shape
    mp = _round_up(m, 128)
    if mp != m:
        patches = jnp.pad(patches, ((0, 0), (0, mp - m)))
    tm = _choose_m_tile(mp, k)
    out_dtype = patches.dtype

    w_spec = pl.BlockSpec((cout, k), lambda i: (0, 0))
    b_spec = pl.BlockSpec((cout, 1), lambda i: (0, 0))
    x_spec = pl.BlockSpec((k, tm), lambda i: (0, i))
    o_spec = pl.BlockSpec((cout, tm), lambda i: (0, i))

    wk_c = wk.astype(_MATMUL_DTYPE)
    p_c = patches.astype(_MATMUL_DTYPE)
    bias2 = bias.reshape(cout, 1).astype(jnp.float32)

    if ln is None:
        kernel = functools.partial(_mm_bias_act_kernel, relu=relu)
        args = (wk_c, bias2, p_c)
        in_specs = [w_spec, b_spec, x_spec]
    else:
        gamma, beta = ln
        g_full = jnp.tile(gamma, ln_groups).reshape(cout, 1).astype(jnp.float32)
        bt_full = jnp.tile(beta, ln_groups).reshape(cout, 1).astype(jnp.float32)
        avg = _group_avg(cout, ln_groups)
        kernel = functools.partial(_mm_bias_act_ln_kernel, relu=relu, eps=_LN_EPS)
        args = (wk_c, bias2, g_full, bt_full, avg, p_c)
        g_spec = pl.BlockSpec((cout, 1), lambda i: (0, 0))
        avg_spec = pl.BlockSpec((cout, cout), lambda i: (0, 0))
        in_specs = [w_spec, b_spec, g_spec, g_spec, avg_spec, x_spec]

    out = pl.pallas_call(
        kernel,
        out_shape=jax.ShapeDtypeStruct((cout, mp), out_dtype),
        grid_spec=pltpu.PrefetchScalarGridSpec(
            num_scalar_prefetch=0, grid=(mp // tm,),
            in_specs=in_specs, out_specs=o_spec),
        compiler_params=_compiler_params(),
    )(*args)
    if mp != m:
        out = out[:, :m]
    return out


def conv2d_cf(x, pw, kh, kw, stride, pad, relu=False, ln=None, ln_groups=1):
    """Convolution in channel-first layout.  x: (Cin, N, H, W), pw: {"w": (Cout, KH*KW*Cin),
    "b": (Cout,)}.  Returns (Cout, N, Hout, Wout)."""
    c, n, h, w = x.shape
    cout = pw["w"].shape[0]
    patches, hout, wout = _im2col(x, kh, kw, stride, pad)
    out = mm_bias_act(pw["w"], pw["b"], patches, relu=relu, ln=ln, ln_groups=ln_groups)
    return out.reshape(cout, n, hout, wout)


def conv3_aggregate(p3, pa, patches, x_flat):
    """Fused TransformBlock tail: relu(conv3x3) + concat-free 1x1 aggregate."""
    cmid, k = p3["w"].shape
    cout = pa["wz"].shape[0]
    cin = x_flat.shape[0]
    _, m = patches.shape
    mp = _round_up(m, 128)
    if mp != m:
        patches = jnp.pad(patches, ((0, 0), (0, mp - m)))
        x_flat = jnp.pad(x_flat, ((0, 0), (0, mp - m)))
    tm = _choose_m_tile(mp, k)
    out = pl.pallas_call(
        _conv3_agg_kernel,
        out_shape=jax.ShapeDtypeStruct((cout, mp), x_flat.dtype),
        grid_spec=pltpu.PrefetchScalarGridSpec(
            num_scalar_prefetch=0, grid=(mp // tm,),
            in_specs=[pl.BlockSpec((cmid, k), lambda i: (0, 0)),
                      pl.BlockSpec((cmid, 1), lambda i: (0, 0)),
                      pl.BlockSpec((cout, cmid), lambda i: (0, 0)),
                      pl.BlockSpec((cout, cin), lambda i: (0, 0)),
                      pl.BlockSpec((cout, 1), lambda i: (0, 0)),
                      pl.BlockSpec((k, tm), lambda i: (0, i)),
                      pl.BlockSpec((cin, tm), lambda i: (0, i))],
            out_specs=pl.BlockSpec((cout, tm), lambda i: (0, i))),
        compiler_params=_compiler_params(),
    )(p3["w"].astype(_MATMUL_DTYPE), p3["b"].reshape(cmid, 1).astype(jnp.float32),
      pa["wz"].astype(_MATMUL_DTYPE), pa["wx"].astype(_MATMUL_DTYPE),
      pa["b"].reshape(cout, 1).astype(jnp.float32),
      patches.astype(_MATMUL_DTYPE), x_flat.astype(_MATMUL_DTYPE))
    if mp != m:
        out = out[:, :m]
    return out


def conv_ln_conv(p1, gamma, beta, p2, patches):
    """Fused head tail: LN(relu(conv3x3)) followed by 1x1 conv, one kernel."""
    cmid, k = p1["w"].shape
    cout = p2["w"].shape[0]
    _, m = patches.shape
    mp = _round_up(m, 128)
    if mp != m:
        patches = jnp.pad(patches, ((0, 0), (0, mp - m)))
    tm = _choose_m_tile(mp, k)
    avg = _group_avg(cmid, 1)
    out = pl.pallas_call(
        functools.partial(_conv_ln_conv_kernel, eps=_LN_EPS),
        out_shape=jax.ShapeDtypeStruct((cout, mp), patches.dtype),
        grid_spec=pltpu.PrefetchScalarGridSpec(
            num_scalar_prefetch=0, grid=(mp // tm,),
            in_specs=[pl.BlockSpec((cmid, k), lambda i: (0, 0)),
                      pl.BlockSpec((cmid, 1), lambda i: (0, 0)),
                      pl.BlockSpec((cmid, 1), lambda i: (0, 0)),
                      pl.BlockSpec((cmid, 1), lambda i: (0, 0)),
                      pl.BlockSpec((cmid, cmid), lambda i: (0, 0)),
                      pl.BlockSpec((cout, cmid), lambda i: (0, 0)),
                      pl.BlockSpec((cout, 1), lambda i: (0, 0)),
                      pl.BlockSpec((k, tm), lambda i: (0, i))],
            out_specs=pl.BlockSpec((cout, tm), lambda i: (0, i))),
        compiler_params=_compiler_params(),
    )(p1["w"].astype(_MATMUL_DTYPE), p1["b"].reshape(cmid, 1).astype(jnp.float32),
      gamma.reshape(cmid, 1).astype(jnp.float32), beta.reshape(cmid, 1).astype(jnp.float32),
      avg, p2["w"].astype(_MATMUL_DTYPE), p2["b"].reshape(cout, 1).astype(jnp.float32),
      patches.astype(_MATMUL_DTYPE))
    if mp != m:
        out = out[:, :m]
    return out


# ----------------------------------------------------------------------------
# Model blocks (channel-first (C, N, H, W) internally)
# ----------------------------------------------------------------------------
# TODO(synk): fuse the whole TransformBlock (3x 3x3 conv + aggregate) into a single
# pallas_call keeping per-tile intermediates in VMEM scratch (halo'd spatial tiles).
def transform_block(x, tp):
    c, n, h, w = x.shape
    z = conv2d_cf(x, tp["c1"], 3, 3, 1, 1, relu=True)
    z = conv2d_cf(z, tp["c2"], 3, 3, 1, 1, relu=True)
    # conv3 (3x3 + ReLU) + Dropout2d(identity) + concat-free 1x1 aggregate, fused.
    p, _, _ = _im2col(z, 3, 3, 1, 1)
    out = conv3_aggregate(tp["c3"], tp["agg"], p, x.reshape(c, n * h * w))
    return out.reshape(c, n, h, w)


def encoder_block(x, p):
    x = transform_block(x, p["transform"])
    # Conv2d(4,4,stride=2,pad=1) + ReLU + LayerNorm(channel), fully fused.
    return conv2d_cf(x, p["red"], 4, 4, 2, 1, relu=True, ln=(p["ln_g"], p["ln_b"]))


def decoder_block(x, p):
    x = transform_block(x, p["transform"])
    dim = p["ln_g"].shape[0]
    # ConvTranspose2d(4,4,stride=2,pad=1) via subpixel decomposition: one 3x3 conv over the
    # undilated input producing 4*dim channels (one dim-group per output-pixel parity),
    # with ReLU + per-group LayerNorm fused into the epilogue.
    y = conv2d_cf(x, p["enl"], 3, 3, 1, 1, relu=True,
                  ln=(p["ln_g"], p["ln_b"]), ln_groups=4)          # (4*dim, N, H, W)
    _, n, h, w = y.shape
    y = y.reshape(2, 2, dim, n, h, w)                              # (a, b, c, n, h, w)
    y = jnp.transpose(y, (2, 3, 4, 0, 5, 1)).reshape(dim, n, 2 * h, 2 * w)
    return y


def ae_forward(x_nchw, pk, depth):
    x = jnp.transpose(x_nchw, (1, 0, 2, 3))                        # NCHW -> (C, N, H, W)
    # embed: 1x1 conv (3 -> hidden) with LayerNorm fused; Dropout2d -> identity.
    z = conv2d_cf(x, pk["embed"], 1, 1, 1, 0, relu=False,
                  ln=(pk["embed"]["ln_g"], pk["embed"]["ln_b"]))
    for i in range(depth):
        z = encoder_block(z, pk["encoders"][i])
    # to_transfer / from_transfer: NoneLayer (transfer_dim < 0) -> identity
    for i in range(depth - 1, -1, -1):
        z = decoder_block(z, pk["decoders"][i])
    # head: conv3x3+ReLU, then fused conv3x3+ReLU+LN+conv1x1.
    z = conv2d_cf(z, pk["head"]["c1"], 3, 3, 1, 1, relu=True)
    c, n, h, w = z.shape
    p, _, _ = _im2col(z, 3, 3, 1, 1)
    out = conv_ln_conv(pk["head"]["c2"], pk["head"]["ln_g"], pk["head"]["ln_b"],
                       pk["head"]["c3"], p)
    z = out.reshape(pk["head"]["c3"]["w"].shape[0], n, h, w)
    return jnp.transpose(z, (1, 0, 2, 3))                          # (C, N, H, W) -> NCHW


# ----------------------------------------------------------------------------
# One-time weight packing (hoisted out of the jitted forward)
# ----------------------------------------------------------------------------
def _pack_w(w):
    """(Cout, Cin, KH, KW) -> (Cout, KH*KW*Cin) matching the tap-major im2col layout."""
    cout = w.shape[0]
    return jnp.transpose(w, (0, 2, 3, 1)).reshape(cout, -1)


def _pack_deconv_subpixel(wt, b):
    """ConvTranspose2d(4,4,s=2,p=1) weight (Cin, Cout, 4, 4) -> combined 3x3 conv weight
    (4*Cout, KH*KW*Cin) realizing the 4 subpixel kernels; bias tiled per group."""
    cin, cout = wt.shape[0], wt.shape[1]
    row_map = {0: ((0, 3), (1, 1)), 1: ((1, 2), (2, 0))}   # parity -> ((tap_pos, kh), ...)
    wc = jnp.zeros((4, cout, cin, 3, 3), wt.dtype)
    for a in (0, 1):
        for bb in (0, 1):
            for (r, kh) in row_map[a]:
                for (c, kw) in row_map[bb]:
                    wc = wc.at[a * 2 + bb, :, :, r, c].set(jnp.transpose(wt[:, :, kh, kw]))
    wc = wc.reshape(4 * cout, cin, 3, 3)
    return {"w": _pack_w(wc), "b": jnp.tile(b, 4)}


def _pack_transform(tp):
    dim = tp["c1_w"].shape[0]
    return {
        "c1": {"w": _pack_w(tp["c1_w"]), "b": tp["c1_b"]},
        "c2": {"w": _pack_w(tp["c2_w"]), "b": tp["c2_b"]},
        "c3": {"w": _pack_w(tp["c3_w"]), "b": tp["c3_b"]},
        "agg": {"wz": tp["agg_w"][:, :dim, 0, 0],
                "wx": tp["agg_w"][:, dim:, 0, 0],
                "b": tp["agg_b"]},
    }


def pack_params(params):
    pk = {"embed": {"w": _pack_w(params["embed_w"]), "b": params["embed_b"],
                    "ln_g": params["embed_ln_g"], "ln_b": params["embed_ln_b"]}}
    pk["encoders"] = []
    pk["decoders"] = []
    for ep in params["encoders"]:
        pk["encoders"].append({
            "transform": _pack_transform(ep["transform"]),
            "red": {"w": _pack_w(ep["red_w"]), "b": ep["red_b"]},
            "ln_g": ep["ln_g"], "ln_b": ep["ln_b"]})
    for dp in params["decoders"]:
        pk["decoders"].append({
            "transform": _pack_transform(dp["transform"]),
            "enl": _pack_deconv_subpixel(dp["enl_w"], dp["enl_b"]),
            "ln_g": dp["ln_g"], "ln_b": dp["ln_b"]})
    pk["head"] = {
        "c1": {"w": _pack_w(params["head_c1_w"]), "b": params["head_c1_b"]},
        "c2": {"w": _pack_w(params["head_c2_w"]), "b": params["head_c2_b"]},
        "ln_g": params["head_ln_g"], "ln_b": params["head_ln_b"],
        "c3": {"w": _pack_w(params["head_c3_w"]), "b": params["head_c3_b"]},
    }
    return pk


# ----------------------------------------------------------------------------
# Pure-JAX reference forward (lax.conv) for correctness checking
# ----------------------------------------------------------------------------
def _conv_ref(x, w, b, stride, pad):
    y = jax.lax.conv_general_dilated(
        x, w, window_strides=(stride, stride), padding=((pad, pad), (pad, pad)),
        dimension_numbers=("NCHW", "OIHW", "NCHW"))
    return y + b.reshape(1, -1, 1, 1)


def _convT_ref(x, w, b):   # ConvTranspose2d(4,4,stride=2,pad=1): lhs-dilated conv, flipped W
    wf = jnp.transpose(w, (1, 0, 2, 3))[:, :, ::-1, ::-1]
    y = jax.lax.conv_general_dilated(
        x, wf, window_strides=(1, 1), padding=((2, 2), (2, 2)), lhs_dilation=(2, 2),
        dimension_numbers=("NCHW", "OIHW", "NCHW"))
    return y + b.reshape(1, -1, 1, 1)


def _ln_ref(x, g, b):
    mu = jnp.mean(x, axis=1, keepdims=True)
    var = jnp.mean(jnp.square(x - mu), axis=1, keepdims=True)
    return (x - mu) * jax.lax.rsqrt(var + _LN_EPS) * g.reshape(1, -1, 1, 1) \
        + b.reshape(1, -1, 1, 1)


def _transform_ref(x, tp):
    z = jax.nn.relu(_conv_ref(x, tp["c1_w"], tp["c1_b"], 1, 1))
    z = jax.nn.relu(_conv_ref(z, tp["c2_w"], tp["c2_b"], 1, 1))
    z = jax.nn.relu(_conv_ref(z, tp["c3_w"], tp["c3_b"], 1, 1))
    return _conv_ref(jnp.concatenate([z, x], axis=1), tp["agg_w"], tp["agg_b"], 1, 0)


def ae_forward_ref(x, params, depth):
    z = _ln_ref(_conv_ref(x, params["embed_w"], params["embed_b"], 1, 0),
                params["embed_ln_g"], params["embed_ln_b"])
    for i in range(depth):
        ep = params["encoders"][i]
        z = _transform_ref(z, ep["transform"])
        z = _ln_ref(jax.nn.relu(_conv_ref(z, ep["red_w"], ep["red_b"], 2, 1)),
                    ep["ln_g"], ep["ln_b"])
    for i in range(depth - 1, -1, -1):
        dp = params["decoders"][i]
        z = _transform_ref(z, dp["transform"])
        z = _ln_ref(jax.nn.relu(_convT_ref(z, dp["enl_w"], dp["enl_b"])),
                    dp["ln_g"], dp["ln_b"])
    z = jax.nn.relu(_conv_ref(z, params["head_c1_w"], params["head_c1_b"], 1, 1))
    z = jax.nn.relu(_conv_ref(z, params["head_c2_w"], params["head_c2_b"], 1, 1))
    z = _ln_ref(z, params["head_ln_g"], params["head_ln_b"])
    return _conv_ref(z, params["head_c3_w"], params["head_c3_b"], 1, 0)


# ----------------------------------------------------------------------------
# Deterministic parameter initialization (PyTorch-like uniform fan-in bounds)
# ----------------------------------------------------------------------------
def _conv_init(key, cout, cin, kh, kw):
    kw_, kb_ = jax.random.split(key)
    bound = 1.0 / math.sqrt(cin * kh * kw)
    w = jax.random.uniform(kw_, (cout, cin, kh, kw), jnp.float32, -bound, bound)
    b = jax.random.uniform(kb_, (cout,), jnp.float32, -bound, bound)
    return w, b


def _convT_init(key, cin, cout, kh, kw):
    kw_, kb_ = jax.random.split(key)
    bound = 1.0 / math.sqrt(cin * kh * kw)
    w = jax.random.uniform(kw_, (cin, cout, kh, kw), jnp.float32, -bound, bound)
    b = jax.random.uniform(kb_, (cout,), jnp.float32, -bound, bound)
    return w, b


def _transform_init(key, dim):
    k1, k2, k3, k4 = jax.random.split(key, 4)
    c1w, c1b = _conv_init(k1, dim, dim, 3, 3)
    c2w, c2b = _conv_init(k2, dim, dim, 3, 3)
    c3w, c3b = _conv_init(k3, dim, dim, 3, 3)
    aw, ab = _conv_init(k4, dim, 2 * dim, 1, 1)
    return {"c1_w": c1w, "c1_b": c1b, "c2_w": c2w, "c2_b": c2b,
            "c3_w": c3w, "c3_b": c3b, "agg_w": aw, "agg_b": ab}


def init_params(key, hidden_dim, depth):
    keys = jax.random.split(key, 4 + 2 * depth)
    params = {}
    ew, eb = _conv_init(keys[0], hidden_dim, 3, 1, 1)
    params["embed_w"], params["embed_b"] = ew, eb
    params["embed_ln_g"] = jnp.ones((hidden_dim,), jnp.float32)
    params["embed_ln_b"] = jnp.zeros((hidden_dim,), jnp.float32)

    encoders, decoders = [], []
    for i in range(depth):
        ek, dk = keys[1 + 2 * i], keys[2 + 2 * i]
        ek1, ek2 = jax.random.split(ek)
        rw, rb = _conv_init(ek2, hidden_dim, hidden_dim, 4, 4)
        encoders.append({
            "transform": _transform_init(ek1, hidden_dim),
            "red_w": rw, "red_b": rb,
            "ln_g": jnp.ones((hidden_dim,), jnp.float32),
            "ln_b": jnp.zeros((hidden_dim,), jnp.float32),
        })
        dk1, dk2 = jax.random.split(dk)
        tw, tb = _convT_init(dk2, hidden_dim, hidden_dim, 4, 4)
        decoders.append({
            "transform": _transform_init(dk1, hidden_dim),
            "enl_w": tw, "enl_b": tb,
            "ln_g": jnp.ones((hidden_dim,), jnp.float32),
            "ln_b": jnp.zeros((hidden_dim,), jnp.float32),
        })
    params["encoders"], params["decoders"] = encoders, decoders

    h2 = hidden_dim // 2
    hk1, hk2, hk3 = jax.random.split(keys[1 + 2 * depth], 3)
    params["head_c1_w"], params["head_c1_b"] = _conv_init(hk1, hidden_dim, hidden_dim, 3, 3)
    params["head_c2_w"], params["head_c2_b"] = _conv_init(hk2, h2, hidden_dim, 3, 3)
    params["head_ln_g"] = jnp.ones((h2,), jnp.float32)
    params["head_ln_b"] = jnp.zeros((h2,), jnp.float32)
    params["head_c3_w"], params["head_c3_b"] = _conv_init(hk3, 3, h2, 1, 1)
    return params


# ----------------------------------------------------------------------------
if __name__ == "__main__":
    HIDDEN, DEPTH = 8, 2
    N, H, W = 2, 16, 16

    key = jax.random.PRNGKey(0)
    kx, kp = jax.random.split(key)
    x = jax.random.normal(kx, (N, 3, H, W), jnp.float32)   # NCHW, like PyTorch
    params = init_params(kp, HIDDEN, DEPTH)
    packed = pack_params(params)                            # one-time weight repacking

    fwd = jax.jit(functools.partial(ae_forward, depth=DEPTH))
    out = fwd(x, packed)
    jax.block_until_ready(out)
    assert out.shape == (N, 3, H, W), out.shape
    assert out.dtype == jnp.float32
    assert bool(jnp.all(jnp.isfinite(out)))

    # Numerical check against a pure-JAX (lax.conv) reference of the PyTorch forward.
    ref = jax.jit(functools.partial(ae_forward_ref, depth=DEPTH))(x, params)
    jax.block_until_ready(ref)
    err = float(jnp.max(jnp.abs(out - ref)))
    assert err < 5e-3, f"max abs diff vs reference = {err}"

    print("KERNEL_OK")
</pallas_src>

<mosaic_0001>
module attributes {stable_mosaic.version = 11 : i64} {
  func.func @_mm_bias_act_ln_kernel(%arg0: i32, %arg1: memref<8x3xf32, #tpu.memory_space<vmem>>, %arg2: memref<8x1xf32, #tpu.memory_space<vmem>>, %arg3: memref<8x1xf32, #tpu.memory_space<vmem>>, %arg4: memref<8x1xf32, #tpu.memory_space<vmem>>, %arg5: memref<8x8xf32, #tpu.memory_space<vmem>>, %arg6: memref<3x256xf32, #tpu.memory_space<vmem>>, %arg7: memref<8x256xf32, #tpu.memory_space<vmem>>) attributes {dimension_semantics = [#tpu.dimension_semantics<parallel>], iteration_bounds = array<i64: 2>, scalar_prefetch = 0 : i64, scratch_operands = 0 : i64, tpu.core_type = #tpu.core_type<tc>, window_params = [{pipeline_mode = #tpu.pipeline_mode<synchronous>, transform_indices = @transform_0, window_bounds = array<i64: 8, 3>}, {pipeline_mode = #tpu.pipeline_mode<synchronous>, transform_indices = @transform_1, window_bounds = array<i64: 8, 1>}, {pipeline_mode = #tpu.pipeline_mode<synchronous>, transform_indices = @transform_2, window_bounds = array<i64: 8, 1>}, {pipeline_mode = #tpu.pipeline_mode<synchronous>, transform_indices = @transform_3, window_bounds = array<i64: 8, 1>}, {pipeline_mode = #tpu.pipeline_mode<synchronous>, transform_indices = @transform_4, window_bounds = array<i64: 8, 8>}, {transform_indices = @transform_5, window_bounds = array<i64: 3, 256>}, {transform_indices = @transform_6, window_bounds = array<i64: 8, 256>}]} {
    %c0 = arith.constant 0 : index
    %c0_0 = arith.constant 0 : index
    %0 = vector.load %arg1[%c0, %c0_0] : memref<8x3xf32, #tpu.memory_space<vmem>>, vector<8x3xf32>
    %c0_1 = arith.constant 0 : index
    %c0_2 = arith.constant 0 : index
    %1 = vector.load %arg6[%c0_1, %c0_2] : memref<3x256xf32, #tpu.memory_space<vmem>>, vector<3x256xf32>
    %cst = arith.constant dense<0.000000e+00> : vector<8x256xf32>
    %2 = tpu.matmul %0, %1, %cst {dimension_numbers = #tpu.dot_dimension_numbers<[1], [0], [0], [1], [0, 0, 1, 1], [], []>} : vector<8x3xf32>, vector<3x256xf32>, vector<8x256xf32> -> vector<8x256xf32>
    %c0_3 = arith.constant 0 : index
    %c0_4 = arith.constant 0 : index
    %3 = vector.load %arg2[%c0_3, %c0_4] : memref<8x1xf32, #tpu.memory_space<vmem>>, vector<8x1xf32>
    %4 = vector.broadcast %3 : vector<8x1xf32> to vector<8x256xf32>
    %5 = arith.addf %2, %4 : vector<8x256xf32>
    %c0_5 = arith.constant 0 : index
    %c0_6 = arith.constant 0 : index
    %6 = vector.load %arg5[%c0_5, %c0_6] : memref<8x8xf32, #tpu.memory_space<vmem>>, vector<8x8xf32>
    %cst_7 = arith.constant dense<0.000000e+00> : vector<8x256xf32>
    %7 = tpu.matmul %6, %5, %cst_7 {dimension_numbers = #tpu.dot_dimension_numbers<[1], [0], [0], [1], [0, 0, 1, 1], [], []>} : vector<8x8xf32>, vector<8x256xf32>, vector<8x256xf32> -> vector<8x256xf32>
    %8 = arith.subf %5, %7 : vector<8x256xf32>
    %c0_8 = arith.constant 0 : index
    %c0_9 = arith.constant 0 : index
    %9 = vector.load %arg5[%c0_8, %c0_9] : memref<8x8xf32, #tpu.memory_space<vmem>>, vector<8x8xf32>
    %10 = arith.mulf %8, %8 : vector<8x256xf32>
    %cst_10 = arith.constant dense<0.000000e+00> : vector<8x256xf32>
    %11 = tpu.matmul %9, %10, %cst_10 {dimension_numbers = #tpu.dot_dimension_numbers<[1], [0], [0], [1], [0, 0, 1, 1], [], []>} : vector<8x8xf32>, vector<8x256xf32>, vector<8x256xf32> -> vector<8x256xf32>
    %cst_11 = arith.constant 9.99999974E-6 : f32
    %12 = vector.broadcast %cst_11 : f32 to vector<8x256xf32>
    %13 = arith.addf %11, %12 : vector<8x256xf32>
    %14 = math.rsqrt %13 : vector<8x256xf32>
    %15 = arith.mulf %8, %14 : vector<8x256xf32>
    %c0_12 = arith.constant 0 : index
    %c0_13 = arith.constant 0 : index
    %16 = vector.load %arg3[%c0_12, %c0_13] : memref<8x1xf32, #tpu.memory_space<vmem>>, vector<8x1xf32>
    %17 = vector.broadcast %16 : vector<8x1xf32> to vector<8x256xf32>
    %18 = arith.mulf %15, %17 : vector<8x256xf32>
    %c0_14 = arith.constant 0 : index
    %c0_15 = arith.constant 0 : index
    %19 = vector.load %arg4[%c0_14, %c0_15] : memref<8x1xf32, #tpu.memory_space<vmem>>, vector<8x1xf32>
    %20 = vector.broadcast %19 : vector<8x1xf32> to vector<8x256xf32>
    %21 = arith.addf %18, %20 : vector<8x256xf32>
    %c0_16 = arith.constant 0 : index
    %c0_17 = arith.constant 0 : index
    %22 = vector.load %arg7[%c0_16, %c0_17] : memref<8x256xf32, #tpu.memory_space<vmem>>, vector<8x256xf32>
    tpu.vector_store %arg7[%c0_16, %c0_17], %21 {strides = array<i32>} : memref<8x256xf32, #tpu.memory_space<vmem>>, vector<8x256xf32>,
    return
  }
  func.func @transform_0(%arg0: i32) -> (i32, i32) {
    %c0_i32 = arith.constant 0 : i32
    %c0_i32_0 = arith.constant 0 : i32
    %c0_i32_1 = arith.constant 0 : i32
    return %c0_i32, %c0_i32_0 : i32, i32
  }
  func.func @transform_1(%arg0: i32) -> (i32, i32) {
    %c0_i32 = arith.constant 0 : i32
    %c0_i32_0 = arith.constant 0 : i32
    %c0_i32_1 = arith.constant 0 : i32
    return %c0_i32, %c0_i32_0 : i32, i32
  }
  func.func @transform_2(%arg0: i32) -> (i32, i32) {
    %c0_i32 = arith.constant 0 : i32
    %c0_i32_0 = arith.constant 0 : i32
    %c0_i32_1 = arith.constant 0 : i32
    return %c0_i32, %c0_i32_0 : i32, i32
  }
  func.func @transform_3(%arg0: i32) -> (i32, i32) {
    %c0_i32 = arith.constant 0 : i32
    %c0_i32_0 = arith.constant 0 : i32
    %c0_i32_1 = arith.constant 0 : i32
    return %c0_i32, %c0_i32_0 : i32, i32
  }
  func.func @transform_4(%arg0: i32) -> (i32, i32) {
    %c0_i32 = arith.constant 0 : i32
    %c0_i32_0 = arith.constant 0 : i32
    %c0_i32_1 = arith.constant 0 : i32
    return %c0_i32, %c0_i32_0 : i32, i32
  }
  func.func @transform_5(%arg0: i32) -> (i32, i32) {
    %c0_i32 = arith.constant 0 : i32
    %c0_i32_0 = arith.constant 0 : i32
    return %c0_i32, %arg0 : i32, i32
  }
  func.func @transform_6(%arg0: i32) -> (i32, i32) {
    %c0_i32 = arith.constant 0 : i32
    %c0_i32_0 = arith.constant 0 : i32
    return %c0_i32, %arg0 : i32, i32
  }
}

module attributes {stable_mosaic.version = 11 : i64} {
  func.func @_mm_bias_act_kernel(%arg0: i32, %arg1: memref<8x72xf32, #tpu.memory_space<vmem>>, %arg2: memref<8x1xf32, #tpu.memory_space<vmem>>, %arg3: memref<72x256xf32, #tpu.memory_space<vmem>>, %arg4: memref<8x256xf32, #tpu.memory_space<vmem>>) attributes {dimension_semantics = [#tpu.dimension_semantics<parallel>], iteration_bounds = array<i64: 2>, scalar_prefetch = 0 : i64, scratch_operands = 0 : i64, tpu.core_type = #tpu.core_type<tc>, window_params = [{pipeline_mode = #tpu.pipeline_mode<synchronous>, transform_indices = @transform_0, window_bounds = array<i64: 8, 72>}, {pipeline_mode = #tpu.pipeline_mode<synchronous>, transform_indices = @transform_1, window_bounds = array<i64: 8, 1>}, {transform_indices = @transform_2, window_bounds = array<i64: 72, 256>}, {transform_indices = @transform_3, window_bounds = array<i64: 8, 256>}]} {
    %c0 = arith.constant 0 : index
    %c0_0 = arith.constant 0 : index
    %0 = vector.load %arg1[%c0, %c0_0] : memref<8x72xf32, #tpu.memory_space<vmem>>, vector<8x72xf32>
    %c0_1 = arith.constant 0 : index
    %c0_2 = arith.constant 0 : index
    %1 = vector.load %arg3[%c0_1, %c0_2] : memref<72x256xf32, #tpu.memory_space<vmem>>, vector<72x256xf32>
    %cst = arith.constant dense<0.000000e+00> : vector<8x256xf32>
    %2 = tpu.matmul %0, %1, %cst {dimension_numbers = #tpu.dot_dimension_numbers<[1], [0], [0], [1], [0, 0, 1, 1], [], []>} : vector<8x72xf32>, vector<72x256xf32>, vector<8x256xf32> -> vector<8x256xf32>
    %c0_3 = arith.constant 0 : index
    %c0_4 = arith.constant 0 : index
    %3 = vector.load %arg2[%c0_3, %c0_4] : memref<8x1xf32, #tpu.memory_space<vmem>>, vector<8x1xf32>
    %4 = vector.broadcast %3 : vector<8x1xf32> to vector<8x256xf32>
    %5 = arith.addf %2, %4 : vector<8x256xf32>
    %cst_5 = arith.constant 0.000000e+00 : f32
    %6 = vector.broadcast %cst_5 : f32 to vector<8x256xf32>
    %7 = arith.maximumf %5, %6 : vector<8x256xf32>
    %c0_6 = arith.constant 0 : index
    %c0_7 = arith.constant 0 : index
    %8 = vector.load %arg4[%c0_6, %c0_7] : memref<8x256xf32, #tpu.memory_space<vmem>>, vector<8x256xf32>
    tpu.vector_store %arg4[%c0_6, %c0_7], %7 {strides = array<i32>} : memref<8x256xf32, #tpu.memory_space<vmem>>, vector<8x256xf32>,
    return
  }
  func.func @transform_0(%arg0: i32) -> (i32, i32) {
    %c0_i32 = arith.constant 0 : i32
    %c0_i32_0 = arith.constant 0 : i32
    %c0_i32_1 = arith.constant 0 : i32
    return %c0_i32, %c0_i32_0 : i32, i32
  }
  func.func @transform_1(%arg0: i32) -> (i32, i32) {
    %c0_i32 = arith.constant 0 : i32
    %c0_i32_0 = arith.constant 0 : i32
    %c0_i32_1 = arith.constant 0 : i32
    return %c0_i32, %c0_i32_0 : i32, i32
  }
  func.func @transform_2(%arg0: i32) -> (i32, i32) {
    %c0_i32 = arith.constant 0 : i32
    %c0_i32_0 = arith.constant 0 : i32
    return %c0_i32, %arg0 : i32, i32
  }
  func.func @transform_3(%arg0: i32) -> (i32, i32) {
    %c0_i32 = arith.constant 0 : i32
    %c0_i32_0 = arith.constant 0 : i32
    return %c0_i32, %arg0 : i32, i32
  }
}

module attributes {stable_mosaic.version = 11 : i64} {
  func.func @_conv3_agg_kernel(%arg0: i32, %arg1: memref<8x72xf32, #tpu.memory_space<vmem>>, %arg2: memref<8x1xf32, #tpu.memory_space<vmem>>, %arg3: memref<8x8xf32, #tpu.memory_space<vmem>>, %arg4: memref<8x8xf32, #tpu.memory_space<vmem>>, %arg5: memref<8x1xf32, #tpu.memory_space<vmem>>, %arg6: memref<72x256xf32, #tpu.memory_space<vmem>>, %arg7: memref<8x256xf32, #tpu.memory_space<vmem>>, %arg8: memref<8x256xf32, #tpu.memory_space<vmem>>) attributes {dimension_semantics = [#tpu.dimension_semantics<parallel>], iteration_bounds = array<i64: 2>, scalar_prefetch = 0 : i64, scratch_operands = 0 : i64, tpu.core_type = #tpu.core_type<tc>, window_params = [{pipeline_mode = #tpu.pipeline_mode<synchronous>, transform_indices = @transform_0, window_bounds = array<i64: 8, 72>}, {pipeline_mode = #tpu.pipeline_mode<synchronous>, transform_indices = @transform_1, window_bounds = array<i64: 8, 1>}, {pipeline_mode = #tpu.pipeline_mode<synchronous>, transform_indices = @transform_2, window_bounds = array<i64: 8, 8>}, {pipeline_mode = #tpu.pipeline_mode<synchronous>, transform_indices = @transform_3, window_bounds = array<i64: 8, 8>}, {pipeline_mode = #tpu.pipeline_mode<synchronous>, transform_indices = @transform_4, window_bounds = array<i64: 8, 1>}, {transform_indices = @transform_5, window_bounds = array<i64: 72, 256>}, {transform_indices = @transform_6, window_bounds = array<i64: 8, 256>}, {transform_indices = @transform_7, window_bounds = array<i64: 8, 256>}]} {
    %c0 = arith.constant 0 : index
    %c0_0 = arith.constant 0 : index
    %0 = vector.load %arg1[%c0, %c0_0] : memref<8x72xf32, #tpu.memory_space<vmem>>, vector<8x72xf32>
    %c0_1 = arith.constant 0 : index
    %c0_2 = arith.constant 0 : index
    %1 = vector.load %arg6[%c0_1, %c0_2] : memref<72x256xf32, #tpu.memory_space<vmem>>, vector<72x256xf32>
    %cst = arith.constant dense<0.000000e+00> : vector<8x256xf32>
    %2 = tpu.matmul %0, %1, %cst {dimension_numbers = #tpu.dot_dimension_numbers<[1], [0], [0], [1], [0, 0, 1, 1], [], []>} : vector<8x72xf32>, vector<72x256xf32>, vector<8x256xf32> -> vector<8x256xf32>
    %c0_3 = arith.constant 0 : index
    %c0_4 = arith.constant 0 : index
    %3 = vector.load %arg2[%c0_3, %c0_4] : memref<8x1xf32, #tpu.memory_space<vmem>>, vector<8x1xf32>
    %4 = vector.broadcast %3 : vector<8x1xf32> to vector<8x256xf32>
    %5 = arith.addf %2, %4 : vector<8x256xf32>
    %cst_5 = arith.constant 0.000000e+00 : f32
    %6 = vector.broadcast %cst_5 : f32 to vector<8x256xf32>
    %7 = arith.maximumf %5, %6 : vector<8x256xf32>
    %c0_6 = arith.constant 0 : index
    %c0_7 = arith.constant 0 : index
    %8 = vector.load %arg3[%c0_6, %c0_7] : memref<8x8xf32, #tpu.memory_space<vmem>>, vector<8x8xf32>
    %cst_8 = arith.constant dense<0.000000e+00> : vector<8x256xf32>
    %9 = tpu.matmul %8, %7, %cst_8 {dimension_numbers = #tpu.dot_dimension_numbers<[1], [0], [0], [1], [0, 0, 1, 1], [], []>} : vector<8x8xf32>, vector<8x256xf32>, vector<8x256xf32> -> vector<8x256xf32>
    %c0_9 = arith.constant 0 : index
    %c0_10 = arith.constant 0 : index
    %10 = vector.load %arg4[%c0_9, %c0_10] : memref<8x8xf32, #tpu.memory_space<vmem>>, vector<8x8xf32>
    %c0_11 = arith.constant 0 : index
    %c0_12 = arith.constant 0 : index
    %11 = vector.load %arg7[%c0_11, %c0_12] : memref<8x256xf32, #tpu.memory_space<vmem>>, vector<8x256xf32>
    %cst_13 = arith.constant dense<0.000000e+00> : vector<8x256xf32>
    %12 = tpu.matmul %10, %11, %cst_13 {dimension_numbers = #tpu.dot_dimension_numbers<[1], [0], [0], [1], [0, 0, 1, 1], [], []>} : vector<8x8xf32>, vector<8x256xf32>, vector<8x256xf32> -> vector<8x256xf32>
    %13 = arith.addf %9, %12 : vector<8x256xf32>
    %c0_14 = arith.constant 0 : index
    %c0_15 = arith.constant 0 : index
    %14 = vector.load %arg5[%c0_14, %c0_15] : memref<8x1xf32, #tpu.memory_space<vmem>>, vector<8x1xf32>
    %15 = vector.broadcast %14 : vector<8x1xf32> to vector<8x256xf32>
    %16 = arith.addf %13, %15 : vector<8x256xf32>
    %c0_16 = arith.constant 0 : index
    %c0_17 = arith.constant 0 : index
    %17 = vector.load %arg8[%c0_16, %c0_17] : memref<8x256xf32, #tpu.memory_space<vmem>>, vector<8x256xf32>
    tpu.vector_store %arg8[%c0_16, %c0_17], %16 {strides = array<i32>} : memref<8x256xf32, #tpu.memory_space<vmem>>, vector<8x256xf32>,
    return
  }
  func.func @transform_0(%arg0: i32) -> (i32, i32) {
    %c0_i32 = arith.constant 0 : i32
    %c0_i32_0 = arith.constant 0 : i32
    %c0_i32_1 = arith.constant 0 : i32
    return %c0_i32, %c0_i32_0 : i32, i32
  }
  func.func @transform_1(%arg0: i32) -> (i32, i32) {
    %c0_i32 = arith.constant 0 : i32
    %c0_i32_0 = arith.constant 0 : i32
    %c0_i32_1 = arith.constant 0 : i32
    return %c0_i32, %c0_i32_0 : i32, i32
  }
  func.func @transform_2(%arg0: i32) -> (i32, i32) {
    %c0_i32 = arith.constant 0 : i32
    %c0_i32_0 = arith.constant 0 : i32
    %c0_i32_1 = arith.constant 0 : i32
    return %c0_i32, %c0_i32_0 : i32, i32
  }
  func.func @transform_3(%arg0: i32) -> (i32, i32) {
    %c0_i32 = arith.constant 0 : i32
    %c0_i32_0 = arith.constant 0 : i32
    %c0_i32_1 = arith.constant 0 : i32
    return %c0_i32, %c0_i32_0 : i32, i32
  }
  func.func @transform_4(%arg0: i32) -> (i32, i32) {
    %c0_i32 = arith.constant 0 : i32
    %c0_i32_0 = arith.constant 0 : i32
    %c0_i32_1 = arith.constant 0 : i32
    return %c0_i32, %c0_i32_0 : i32, i32
  }
  func.func @transform_5(%arg0: i32) -> (i32, i32) {
    %c0_i32 = arith.constant 0 : i32
    %c0_i32_0 = arith.constant 0 : i32
    return %c0_i32, %arg0 : i32, i32
  }
  func.func @transform_6(%arg0: i32) -> (i32, i32) {
    %c0_i32 = arith.constant 0 : i32
    %c0_i32_0 = arith.constant 0 : i32
    return %c0_i32, %arg0 : i32, i32
  }
  func.func @transform_7(%arg0: i32) -> (i32, i32) {
    %c0_i32 = arith.constant 0 : i32
    %c0_i32_0 = arith.constant 0 : i32
    return %c0_i32, %arg0 : i32, i32
  }
}

module attributes {stable_mosaic.version = 11 : i64} {
  func.func @_mm_bias_act_ln_kernel(%arg0: i32, %arg1: memref<8x128xf32, #tpu.memory_space<vmem>>, %arg2: memref<8x1xf32, #tpu.memory_space<vmem>>, %arg3: memref<8x1xf32, #tpu.memory_space<vmem>>, %arg4: memref<8x1xf32, #tpu.memory_space<vmem>>, %arg5: memref<8x8xf32, #tpu.memory_space<vmem>>, %arg6: memref<128x128xf32, #tpu.memory_space<vmem>>, %arg7: memref<8x128xf32, #tpu.memory_space<vmem>>) attributes {dimension_semantics = [#tpu.dimension_semantics<parallel>], iteration_bounds = array<i64: 1>, scalar_prefetch = 0 : i64, scratch_operands = 0 : i64, tpu.core_type = #tpu.core_type<tc>, window_params = [{pipeline_mode = #tpu.pipeline_mode<synchronous>, transform_indices = @transform_0, window_bounds = array<i64: 8, 128>}, {pipeline_mode = #tpu.pipeline_mode<synchronous>, transform_indices = @transform_1, window_bounds = array<i64: 8, 1>}, {pipeline_mode = #tpu.pipeline_mode<synchronous>, transform_indices = @transform_2, window_bounds = array<i64: 8, 1>}, {pipeline_mode = #tpu.pipeline_mode<synchronous>, transform_indices = @transform_3, window_bounds = array<i64: 8, 1>}, {pipeline_mode = #tpu.pipeline_mode<synchronous>, transform_indices = @transform_4, window_bounds = array<i64: 8, 8>}, {transform_indices = @transform_5, window_bounds = array<i64: 128, 128>}, {transform_indices = @transform_6, window_bounds = array<i64: 8, 128>}]} {
    %c0 = arith.constant 0 : index
    %c0_0 = arith.constant 0 : index
    %0 = vector.load %arg1[%c0, %c0_0] : memref<8x128xf32, #tpu.memory_space<vmem>>, vector<8x128xf32>
    %c0_1 = arith.constant 0 : index
    %c0_2 = arith.constant 0 : index
    %1 = vector.load %arg6[%c0_1, %c0_2] : memref<128x128xf32, #tpu.memory_space<vmem>>, vector<128x128xf32>
    %cst = arith.constant dense<0.000000e+00> : vector<8x128xf32>
    %2 = tpu.matmul %0, %1, %cst {dimension_numbers = #tpu.dot_dimension_numbers<[1], [0], [0], [1], [0, 0, 1, 1], [], []>} : vector<8x128xf32>, vector<128x128xf32>, vector<8x128xf32> -> vector<8x128xf32>
    %c0_3 = arith.constant 0 : index
    %c0_4 = arith.constant 0 : index
    %3 = vector.load %arg2[%c0_3, %c0_4] : memref<8x1xf32, #tpu.memory_space<vmem>>, vector<8x1xf32>
    %4 = vector.broadcast %3 : vector<8x1xf32> to vector<8x128xf32>
    %5 = arith.addf %2, %4 : vector<8x128xf32>
    %cst_5 = arith.constant 0.000000e+00 : f32
    %6 = vector.broadcast %cst_5 : f32 to vector<8x128xf32>
    %7 = arith.maximumf %5, %6 : vector<8x128xf32>
    %c0_6 = arith.constant 0 : index
    %c0_7 = arith.constant 0 : index
    %8 = vector.load %arg5[%c0_6, %c0_7] : memref<8x8xf32, #tpu.memory_space<vmem>>, vector<8x8xf32>
    %cst_8 = arith.constant dense<0.000000e+00> : vector<8x128xf32>
    %9 = tpu.matmul %8, %7, %cst_8 {dimension_numbers = #tpu.dot_dimension_numbers<[1], [0], [0], [1], [0, 0, 1, 1], [], []>} : vector<8x8xf32>, vector<8x128xf32>, vector<8x128xf32> -> vector<8x128xf32>
    %10 = arith.subf %7, %9 : vector<8x128xf32>
    %c0_9 = arith.constant 0 : index
    %c0_10 = arith.constant 0 : index
    %11 = vector.load %arg5[%c0_9, %c0_10] : memref<8x8xf32, #tpu.memory_space<vmem>>, vector<8x8xf32>
    %12 = arith.mulf %10, %10 : vector<8x128xf32>
    %cst_11 = arith.constant dense<0.000000e+00> : vector<8x128xf32>
    %13 = tpu.matmul %11, %12, %cst_11 {dimension_numbers = #tpu.dot_dimension_numbers<[1], [0], [0], [1], [0, 0, 1, 1], [], []>} : vector<8x8xf32>, vector<8x128xf32>, vector<8x128xf32> -> vector<8x128xf32>
    %cst_12 = arith.constant 9.99999974E-6 : f32
    %14 = vector.broadcast %cst_12 : f32 to vector<8x128xf32>
    %15 = arith.addf %13, %14 : vector<8x128xf32>
    %16 = math.rsqrt %15 : vector<8x128xf32>
    %17 = arith.mulf %10, %16 : vector<8x128xf32>
    %c0_13 = arith.constant 0 : index
    %c0_14 = arith.constant 0 : index
    %18 = vector.load %arg3[%c0_13, %c0_14] : memref<8x1xf32, #tpu.memory_space<vmem>>, vector<8x1xf32>
    %19 = vector.broadcast %18 : vector<8x1xf32> to vector<8x128xf32>
    %20 = arith.mulf %17, %19 : vector<8x128xf32>
    %c0_15 = arith.constant 0 : index
    %c0_16 = arith.constant 0 : index
    %21 = vector.load %arg4[%c0_15, %c0_16] : memref<8x1xf32, #tpu.memory_space<vmem>>, vector<8x1xf32>
    %22 = vector.broadcast %21 : vector<8x1xf32> to vector<8x128xf32>
    %23 = arith.addf %20, %22 : vector<8x128xf32>
    %c0_17 = arith.constant 0 : index
    %c0_18 = arith.constant 0 : index
    %24 = vector.load %arg7[%c0_17, %c0_18] : memref<8x128xf32, #tpu.memory_space<vmem>>, vector<8x128xf32>
    tpu.vector_store %arg7[%c0_17, %c0_18], %23 {strides = array<i32>} : memref<8x128xf32, #tpu.memory_space<vmem>>, vector<8x128xf32>,
    return
  }
  func.func @transform_0(%arg0: i32) -> (i32, i32) {
    %c0_i32 = arith.constant 0 : i32
    %c0_i32_0 = arith.constant 0 : i32
    %c0_i32_1 = arith.constant 0 : i32
    return %c0_i32, %c0_i32_0 : i32, i32
  }
  func.func @transform_1(%arg0: i32) -> (i32, i32) {
    %c0_i32 = arith.constant 0 : i32
    %c0_i32_0 = arith.constant 0 : i32
    %c0_i32_1 = arith.constant 0 : i32
    return %c0_i32, %c0_i32_0 : i32, i32
  }
  func.func @transform_2(%arg0: i32) -> (i32, i32) {
    %c0_i32 = arith.constant 0 : i32
    %c0_i32_0 = arith.constant 0 : i32
    %c0_i32_1 = arith.constant 0 : i32
    return %c0_i32, %c0_i32_0 : i32, i32
  }
  func.func @transform_3(%arg0: i32) -> (i32, i32) {
    %c0_i32 = arith.constant 0 : i32
    %c0_i32_0 = arith.constant 0 : i32
    %c0_i32_1 = arith.constant 0 : i32
    return %c0_i32, %c0_i32_0 : i32, i32
  }
  func.func @transform_4(%arg0: i32) -> (i32, i32) {
    %c0_i32 = arith.constant 0 : i32
    %c0_i32_0 = arith.constant 0 : i32
    %c0_i32_1 = arith.constant 0 : i32
    return %c0_i32, %c0_i32_0 : i32, i32
  }
  func.func @transform_5(%arg0: i32) -> (i32, i32) {
    %c0_i32 = arith.constant 0 : i32
    %c0_i32_0 = arith.constant 0 : i32
    return %c0_i32, %arg0 : i32, i32
  }
  func.func @transform_6(%arg0: i32) -> (i32, i32) {
    %c0_i32 = arith.constant 0 : i32
    %c0_i32_0 = arith.constant 0 : i32
    return %c0_i32, %arg0 : i32, i32
  }
}

module attributes {stable_mosaic.version = 11 : i64} {
  func.func @_mm_bias_act_kernel(%arg0: i32, %arg1: memref<8x72xf32, #tpu.memory_space<vmem>>, %arg2: memref<8x1xf32, #tpu.memory_space<vmem>>, %arg3: memref<72x128xf32, #tpu.memory_space<vmem>>, %arg4: memref<8x128xf32, #tpu.memory_space<vmem>>) attributes {dimension_semantics = [#tpu.dimension_semantics<parallel>], iteration_bounds = array<i64: 1>, scalar_prefetch = 0 : i64, scratch_operands = 0 : i64, tpu.core_type = #tpu.core_type<tc>, window_params = [{pipeline_mode = #tpu.pipeline_mode<synchronous>, transform_indices = @transform_0, window_bounds = array<i64: 8, 72>}, {pipeline_mode = #tpu.pipeline_mode<synchronous>, transform_indices = @transform_1, window_bounds = array<i64: 8, 1>}, {transform_indices = @transform_2, window_bounds = array<i64: 72, 128>}, {transform_indices = @transform_3, window_bounds = array<i64: 8, 128>}]} {
    %c0 = arith.constant 0 : index
    %c0_0 = arith.constant 0 : index
    %0 = vector.load %arg1[%c0, %c0_0] : memref<8x72xf32, #tpu.memory_space<vmem>>, vector<8x72xf32>
    %c0_1 = arith.constant 0 : index
    %c0_2 = arith.constant 0 : index
    %1 = vector.load %arg3[%c0_1, %c0_2] : memref<72x128xf32, #tpu.memory_space<vmem>>, vector<72x128xf32>
    %cst = arith.constant dense<0.000000e+00> : vector<8x128xf32>
    %2 = tpu.matmul %0, %1, %cst {dimension_numbers = #tpu.dot_dimension_numbers<[1], [0], [0], [1], [0, 0, 1, 1], [], []>} : vector<8x72xf32>, vector<72x128xf32>, vector<8x128xf32> -> vector<8x128xf32>
    %c0_3 = arith.constant 0 : index
    %c0_4 = arith.constant 0 : index
    %3 = vector.load %arg2[%c0_3, %c0_4] : memref<8x1xf32, #tpu.memory_space<vmem>>, vector<8x1xf32>
    %4 = vector.broadcast %3 : vector<8x1xf32> to vector<8x128xf32>
    %5 = arith.addf %2, %4 : vector<8x128xf32>
    %cst_5 = arith.constant 0.000000e+00 : f32
    %6 = vector.broadcast %cst_5 : f32 to vector<8x128xf32>
    %7 = arith.maximumf %5, %6 : vector<8x128xf32>
    %c0_6 = arith.constant 0 : index
    %c0_7 = arith.constant 0 : index
    %8 = vector.load %arg4[%c0_6, %c0_7] : memref<8x128xf32, #tpu.memory_space<vmem>>, vector<8x128xf32>
    tpu.vector_store %arg4[%c0_6, %c0_7], %7 {strides = array<i32>} : memref<8x128xf32, #tpu.memory_space<vmem>>, vector<8x128xf32>,
    return
  }
  func.func @transform_0(%arg0: i32) -> (i32, i32) {
    %c0_i32 = arith.constant 0 : i32
    %c0_i32_0 = arith.constant 0 : i32
    %c0_i32_1 = arith.constant 0 : i32
    return %c0_i32, %c0_i32_0 : i32, i32
  }
  func.func @transform_1(%arg0: i32) -> (i32, i32) {
    %c0_i32 = arith.constant 0 : i32
    %c0_i32_0 = arith.constant 0 : i32
    %c0_i32_1 = arith.constant 0 : i32
    return %c0_i32, %c0_i32_0 : i32, i32
  }
  func.func @transform_2(%arg0: i32) -> (i32, i32) {
    %c0_i32 = arith.constant 0 : i32
    %c0_i32_0 = arith.constant 0 : i32
    return %c0_i32, %arg0 : i32, i32
  }
  func.func @transform_3(%arg0: i32) -> (i32, i32) {
    %c0_i32 = arith.constant 0 : i32
    %c0_i32_0 = arith.constant 0 : i32
    return %c0_i32, %arg0 : i32, i32
  }
}

module attributes {stable_mosaic.version = 11 : i64} {
  func.func @_conv3_agg_kernel(%arg0: i32, %arg1: memref<8x72xf32, #tpu.memory_space<vmem>>, %arg2: memref<8x1xf32, #tpu.memory_space<vmem>>, %arg3: memref<8x8xf32, #tpu.memory_space<vmem>>, %arg4: memref<8x8xf32, #tpu.memory_space<vmem>>, %arg5: memref<8x1xf32, #tpu.memory_space<vmem>>, %arg6: memref<72x128xf32, #tpu.memory_space<vmem>>, %arg7: memref<8x128xf32, #tpu.memory_space<vmem>>, %arg8: memref<8x128xf32, #tpu.memory_space<vmem>>) attributes {dimension_semantics = [#tpu.dimension_semantics<parallel>], iteration_bounds = array<i64: 1>, scalar_prefetch = 0 : i64, scratch_operands = 0 : i64, tpu.core_type = #tpu.core_type<tc>, window_params = [{pipeline_mode = #tpu.pipeline_mode<synchronous>, transform_indices = @transform_0, window_bounds = array<i64: 8, 72>}, {pipeline_mode = #tpu.pipeline_mode<synchronous>, transform_indices = @transform_1, window_bounds = array<i64: 8, 1>}, {pipeline_mode = #tpu.pipeline_mode<synchronous>, transform_indices = @transform_2, window_bounds = array<i64: 8, 8>}, {pipeline_mode = #tpu.pipeline_mode<synchronous>, transform_indices = @transform_3, window_bounds = array<i64: 8, 8>}, {pipeline_mode = #tpu.pipeline_mode<synchronous>, transform_indices = @transform_4, window_bounds = array<i64: 8, 1>}, {transform_indices = @transform_5, window_bounds = array<i64: 72, 128>}, {transform_indices = @transform_6, window_bounds = array<i64: 8, 128>}, {transform_indices = @transform_7, window_bounds = array<i64: 8, 128>}]} {
    %c0 = arith.constant 0 : index
    %c0_0 = arith.constant 0 : index
    %0 = vector.load %arg1[%c0, %c0_0] : memref<8x72xf32, #tpu.memory_space<vmem>>, vector<8x72xf32>
    %c0_1 = arith.constant 0 : index
    %c0_2 = arith.constant 0 : index
    %1 = vector.load %arg6[%c0_1, %c0_2] : memref<72x128xf32, #tpu.memory_space<vmem>>, vector<72x128xf32>
    %cst = arith.constant dense<0.000000e+00> : vector<8x128xf32>
    %2 = tpu.matmul %0, %1, %cst {dimension_numbers = #tpu.dot_dimension_numbers<[1], [0], [0], [1], [0, 0, 1, 1], [], []>} : vector<8x72xf32>, vector<72x128xf32>, vector<8x128xf32> -> vector<8x128xf32>
    %c0_3 = arith.constant 0 : index
    %c0_4 = arith.constant 0 : index
    %3 = vector.load %arg2[%c0_3, %c0_4] : memref<8x1xf32, #tpu.memory_space<vmem>>, vector<8x1xf32>
    %4 = vector.broadcast %3 : vector<8x1xf32> to vector<8x128xf32>
    %5 = arith.addf %2, %4 : vector<8x128xf32>
    %cst_5 = arith.constant 0.000000e+00 : f32
    %6 = vector.broadcast %cst_5 : f32 to vector<8x128xf32>
    %7 = arith.maximumf %5, %6 : vector<8x128xf32>
    %c0_6 = arith.constant 0 : index
    %c0_7 = arith.constant 0 : index
    %8 = vector.load %arg3[%c0_6, %c0_7] : memref<8x8xf32, #tpu.memory_space<vmem>>, vector<8x8xf32>
    %cst_8 = arith.constant dense<0.000000e+00> : vector<8x128xf32>
    %9 = tpu.matmul %8, %7, %cst_8 {dimension_numbers = #tpu.dot_dimension_numbers<[1], [0], [0], [1], [0, 0, 1, 1], [], []>} : vector<8x8xf32>, vector<8x128xf32>, vector<8x128xf32> -> vector<8x128xf32>
    %c0_9 = arith.constant 0 : index
    %c0_10 = arith.constant 0 : index
    %10 = vector.load %arg4[%c0_9, %c0_10] : memref<8x8xf32, #tpu.memory_space<vmem>>, vector<8x8xf32>
    %c0_11 = arith.constant 0 : index
    %c0_12 = arith.constant 0 : index
    %11 = vector.load %arg7[%c0_11, %c0_12] : memref<8x128xf32, #tpu.memory_space<vmem>>, vector<8x128xf32>
    %cst_13 = arith.constant dense<0.000000e+00> : vector<8x128xf32>
    %12 = tpu.matmul %10, %11, %cst_13 {dimension_numbers = #tpu.dot_dimension_numbers<[1], [0], [0], [1], [0, 0, 1, 1], [], []>} : vector<8x8xf32>, vector<8x128xf32>, vector<8x128xf32> -> vector<8x128xf32>
    %13 = arith.addf %9, %12 : vector<8x128xf32>
    %c0_14 = arith.constant 0 : index
    %c0_15 = arith.constant 0 : index
    %14 = vector.load %arg5[%c0_14, %c0_15] : memref<8x1xf32, #tpu.memory_space<vmem>>, vector<8x1xf32>
    %15 = vector.broadcast %14 : vector<8x1xf32> to vector<8x128xf32>
    %16 = arith.addf %13, %15 : vector<8x128xf32>
    %c0_16 = arith.constant 0 : index
    %c0_17 = arith.constant 0 : index
    %17 = vector.load %arg8[%c0_16, %c0_17] : memref<8x128xf32, #tpu.memory_space<vmem>>, vector<8x128xf32>
    tpu.vector_store %arg8[%c0_16, %c0_17], %16 {strides = array<i32>} : memref<8x128xf32, #tpu.memory_space<vmem>>, vector<8x128xf32>,
    return
  }
  func.func @transform_0(%arg0: i32) -> (i32, i32) {
    %c0_i32 = arith.constant 0 : i32
    %c0_i32_0 = arith.constant 0 : i32
    %c0_i32_1 = arith.constant 0 : i32
    return %c0_i32, %c0_i32_0 : i32, i32
  }
  func.func @transform_1(%arg0: i32) -> (i32, i32) {
    %c0_i32 = arith.constant 0 : i32
    %c0_i32_0 = arith.constant 0 : i32
    %c0_i32_1 = arith.constant 0 : i32
    return %c0_i32, %c0_i32_0 : i32, i32
  }
  func.func @transform_2(%arg0: i32) -> (i32, i32) {
    %c0_i32 = arith.constant 0 : i32
    %c0_i32_0 = arith.constant 0 : i32
    %c0_i32_1 = arith.constant 0 : i32
    return %c0_i32, %c0_i32_0 : i32, i32
  }
  func.func @transform_3(%arg0: i32) -> (i32, i32) {
    %c0_i32 = arith.constant 0 : i32
    %c0_i32_0 = arith.constant 0 : i32
    %c0_i32_1 = arith.constant 0 : i32
    return %c0_i32, %c0_i32_0 : i32, i32
  }
  func.func @transform_4(%arg0: i32) -> (i32, i32) {
    %c0_i32 = arith.constant 0 : i32
    %c0_i32_0 = arith.constant 0 : i32
    %c0_i32_1 = arith.constant 0 : i32
    return %c0_i32, %c0_i32_0 : i32, i32
  }
  func.func @transform_5(%arg0: i32) -> (i32, i32) {
    %c0_i32 = arith.constant 0 : i32
    %c0_i32_0 = arith.constant 0 : i32
    return %c0_i32, %arg0 : i32, i32
  }
  func.func @transform_6(%arg0: i32) -> (i32, i32) {
    %c0_i32 = arith.constant 0 : i32
    %c0_i32_0 = arith.constant 0 : i32
    return %c0_i32, %arg0 : i32, i32
  }
  func.func @transform_7(%arg0: i32) -> (i32, i32) {
    %c0_i32 = arith.constant 0 : i32
    %c0_i32_0 = arith.constant 0 : i32
    return %c0_i32, %arg0 : i32, i32
  }
}

module attributes {stable_mosaic.version = 11 : i64} {
  func.func @_mm_bias_act_ln_kernel(%arg0: i32, %arg1: memref<32x72xf32, #tpu.memory_space<vmem>>, %arg2: memref<32x1xf32, #tpu.memory_space<vmem>>, %arg3: memref<32x1xf32, #tpu.memory_space<vmem>>, %arg4: memref<32x1xf32, #tpu.memory_space<vmem>>, %arg5: memref<32x32xf32, #tpu.memory_space<vmem>>, %arg6: memref<72x128xf32, #tpu.memory_space<vmem>>, %arg7: memref<32x128xf32, #tpu.memory_space<vmem>>) attributes {dimension_semantics = [#tpu.dimension_semantics<parallel>], iteration_bounds = array<i64: 1>, scalar_prefetch = 0 : i64, scratch_operands = 0 : i64, tpu.core_type = #tpu.core_type<tc>, window_params = [{pipeline_mode = #tpu.pipeline_mode<synchronous>, transform_indices = @transform_0, window_bounds = array<i64: 32, 72>}, {pipeline_mode = #tpu.pipeline_mode<synchronous>, transform_indices = @transform_1, window_bounds = array<i64: 32, 1>}, {pipeline_mode = #tpu.pipeline_mode<synchronous>, transform_indices = @transform_2, window_bounds = array<i64: 32, 1>}, {pipeline_mode = #tpu.pipeline_mode<synchronous>, transform_indices = @transform_3, window_bounds = array<i64: 32, 1>}, {pipeline_mode = #tpu.pipeline_mode<synchronous>, transform_indices = @transform_4, window_bounds = array<i64: 32, 32>}, {transform_indices = @transform_5, window_bounds = array<i64: 72, 128>}, {transform_indices = @transform_6, window_bounds = array<i64: 32, 128>}]} {
    %c0 = arith.constant 0 : index
    %c0_0 = arith.constant 0 : index
    %0 = vector.load %arg1[%c0, %c0_0] : memref<32x72xf32, #tpu.memory_space<vmem>>, vector<32x72xf32>
    %c0_1 = arith.constant 0 : index
    %c0_2 = arith.constant 0 : index
    %1 = vector.load %arg6[%c0_1, %c0_2] : memref<72x128xf32, #tpu.memory_space<vmem>>, vector<72x128xf32>
    %cst = arith.constant dense<0.000000e+00> : vector<32x128xf32>
    %2 = tpu.matmul %0, %1, %cst {dimension_numbers = #tpu.dot_dimension_numbers<[1], [0], [0], [1], [0, 0, 1, 1], [], []>} : vector<32x72xf32>, vector<72x128xf32>, vector<32x128xf32> -> vector<32x128xf32>
    %c0_3 = arith.constant 0 : index
    %c0_4 = arith.constant 0 : index
    %3 = vector.load %arg2[%c0_3, %c0_4] : memref<32x1xf32, #tpu.memory_space<vmem>>, vector<32x1xf32>
    %4 = vector.broadcast %3 : vector<32x1xf32> to vector<32x128xf32>
    %5 = arith.addf %2, %4 : vector<32x128xf32>
    %cst_5 = arith.constant 0.000000e+00 : f32
    %6 = vector.broadcast %cst_5 : f32 to vector<32x128xf32>
    %7 = arith.maximumf %5, %6 : vector<32x128xf32>
    %c0_6 = arith.constant 0 : index
    %c0_7 = arith.constant 0 : index
    %8 = vector.load %arg5[%c0_6, %c0_7] : memref<32x32xf32, #tpu.memory_space<vmem>>, vector<32x32xf32>
    %cst_8 = arith.constant dense<0.000000e+00> : vector<32x128xf32>
    %9 = tpu.matmul %8, %7, %cst_8 {dimension_numbers = #tpu.dot_dimension_numbers<[1], [0], [0], [1], [0, 0, 1, 1], [], []>} : vector<32x32xf32>, vector<32x128xf32>, vector<32x128xf32> -> vector<32x128xf32>
    %10 = arith.subf %7, %9 : vector<32x128xf32>
    %c0_9 = arith.constant 0 : index
    %c0_10 = arith.constant 0 : index
    %11 = vector.load %arg5[%c0_9, %c0_10] : memref<32x32xf32, #tpu.memory_space<vmem>>, vector<32x32xf32>
    %12 = arith.mulf %10, %10 : vector<32x128xf32>
    %cst_11 = arith.constant dense<0.000000e+00> : vector<32x128xf32>
    %13 = tpu.matmul %11, %12, %cst_11 {dimension_numbers = #tpu.dot_dimension_numbers<[1], [0], [0], [1], [0, 0, 1, 1], [], []>} : vector<32x32xf32>, vector<32x128xf32>, vector<32x128xf32> -> vector<32x128xf32>
    %cst_12 = arith.constant 9.99999974E-6 : f32
    %14 = vector.broadcast %cst_12 : f32 to vector<32x128xf32>
    %15 = arith.addf %13, %14 : vector<32x128xf32>
    %16 = math.rsqrt %15 : vector<32x128xf32>
    %17 = arith.mulf %10, %16 : vector<32x128xf32>
    %c0_13 = arith.constant 0 : index
    %c0_14 = arith.constant 0 : index
    %18 = vector.load %arg3[%c0_13, %c0_14] : memref<32x1xf32, #tpu.memory_space<vmem>>, vector<32x1xf32>
    %19 = vector.broadcast %18 : vector<32x1xf32> to vector<32x128xf32>
    %20 = arith.mulf %17, %19 : vector<32x128xf32>
    %c0_15 = arith.constant 0 : index
    %c0_16 = arith.constant 0 : index
    %21 = vector.load %arg4[%c0_15, %c0_16] : memref<32x1xf32, #tpu.memory_space<vmem>>, vector<32x1xf32>
    %22 = vector.broadcast %21 : vector<32x1xf32> to vector<32x128xf32>
    %23 = arith.addf %20, %22 : vector<32x128xf32>
    %c0_17 = arith.constant 0 : index
    %c0_18 = arith.constant 0 : index
    %24 = vector.load %arg7[%c0_17, %c0_18] : memref<32x128xf32, #tpu.memory_space<vmem>>, vector<32x128xf32>
    tpu.vector_store %arg7[%c0_17, %c0_18], %23 {strides = array<i32>} : memref<32x128xf32, #tpu.memory_space<vmem>>, vector<32x128xf32>,
    return
  }
  func.func @transform_0(%arg0: i32) -> (i32, i32) {
    %c0_i32 = arith.constant 0 : i32
    %c0_i32_0 = arith.constant 0 : i32
    %c0_i32_1 = arith.constant 0 : i32
    return %c0_i32, %c0_i32_0 : i32, i32
  }
  func.func @transform_1(%arg0: i32) -> (i32, i32) {
    %c0_i32 = arith.constant 0 : i32
    %c0_i32_0 = arith.constant 0 : i32
    %c0_i32_1 = arith.constant 0 : i32
    return %c0_i32, %c0_i32_0 : i32, i32
  }
  func.func @transform_2(%arg0: i32) -> (i32, i32) {
    %c0_i32 = arith.constant 0 : i32
    %c0_i32_0 = arith.constant 0 : i32
    %c0_i32_1 = arith.constant 0 : i32
    return %c0_i32, %c0_i32_0 : i32, i32
  }
  func.func @transform_3(%arg0: i32) -> (i32, i32) {
    %c0_i32 = arith.constant 0 : i32
    %c0_i32_0 = arith.constant 0 : i32
    %c0_i32_1 = arith.constant 0 : i32
    return %c0_i32, %c0_i32_0 : i32, i32
  }
  func.func @transform_4(%arg0: i32) -> (i32, i32) {
    %c0_i32 = arith.constant 0 : i32
    %c0_i32_0 = arith.constant 0 : i32
    %c0_i32_1 = arith.constant 0 : i32
    return %c0_i32, %c0_i32_0 : i32, i32
  }
  func.func @transform_5(%arg0: i32) -> (i32, i32) {
    %c0_i32 = arith.constant 0 : i32
    %c0_i32_0 = arith.constant 0 : i32
    return %c0_i32, %arg0 : i32, i32
  }
  func.func @transform_6(%arg0: i32) -> (i32, i32) {
    %c0_i32 = arith.constant 0 : i32
    %c0_i32_0 = arith.constant 0 : i32
    return %c0_i32, %arg0 : i32, i32
  }
}

module attributes {stable_mosaic.version = 11 : i64} {
  func.func @_conv_ln_conv_kernel(%arg0: i32, %arg1: memref<4x72xf32, #tpu.memory_space<vmem>>, %arg2: memref<4x1xf32, #tpu.memory_space<vmem>>, %arg3: memref<4x1xf32, #tpu.memory_space<vmem>>, %arg4: memref<4x1xf32, #tpu.memory_space<vmem>>, %arg5: memref<4x4xf32, #tpu.memory_space<vmem>>, %arg6: memref<3x4xf32, #tpu.memory_space<vmem>>, %arg7: memref<3x1xf32, #tpu.memory_space<vmem>>, %arg8: memref<72x256xf32, #tpu.memory_space<vmem>>, %arg9: memref<3x256xf32, #tpu.memory_space<vmem>>) attributes {dimension_semantics = [#tpu.dimension_semantics<parallel>], iteration_bounds = array<i64: 2>, scalar_prefetch = 0 : i64, scratch_operands = 0 : i64, tpu.core_type = #tpu.core_type<tc>, window_params = [{pipeline_mode = #tpu.pipeline_mode<synchronous>, transform_indices = @transform_0, window_bounds = array<i64: 4, 72>}, {pipeline_mode = #tpu.pipeline_mode<synchronous>, transform_indices = @transform_1, window_bounds = array<i64: 4, 1>}, {pipeline_mode = #tpu.pipeline_mode<synchronous>, transform_indices = @transform_2, window_bounds = array<i64: 4, 1>}, {pipeline_mode = #tpu.pipeline_mode<synchronous>, transform_indices = @transform_3, window_bounds = array<i64: 4, 1>}, {pipeline_mode = #tpu.pipeline_mode<synchronous>, transform_indices = @transform_4, window_bounds = array<i64: 4, 4>}, {pipeline_mode = #tpu.pipeline_mode<synchronous>, transform_indices = @transform_5, window_bounds = array<i64: 3, 4>}, {pipeline_mode = #tpu.pipeline_mode<synchronous>, transform_indices = @transform_6, window_bounds = array<i64: 3, 1>}, {transform_indices = @transform_7, window_bounds = array<i64: 72, 256>}, {transform_indices = @transform_8, window_bounds = array<i64: 3, 256>}]} {
    %c0 = arith.constant 0 : index
    %c0_0 = arith.constant 0 : index
    %0 = vector.load %arg1[%c0, %c0_0] : memref<4x72xf32, #tpu.memory_space<vmem>>, vector<4x72xf32>
    %c0_1 = arith.constant 0 : index
    %c0_2 = arith.constant 0 : index
    %1 = vector.load %arg8[%c0_1, %c0_2] : memref<72x256xf32, #tpu.memory_space<vmem>>, vector<72x256xf32>
    %cst = arith.constant dense<0.000000e+00> : vector<4x256xf32>
    %2 = tpu.matmul %0, %1, %cst {dimension_numbers = #tpu.dot_dimension_numbers<[1], [0], [0], [1], [0, 0, 1, 1], [], []>} : vector<4x72xf32>, vector<72x256xf32>, vector<4x256xf32> -> vector<4x256xf32>
    %c0_3 = arith.constant 0 : index
    %c0_4 = arith.constant 0 : index
    %3 = vector.load %arg2[%c0_3, %c0_4] : memref<4x1xf32, #tpu.memory_space<vmem>>, vector<4x1xf32>
    %4 = vector.broadcast %3 : vector<4x1xf32> to vector<4x256xf32>
    %5 = arith.addf %2, %4 : vector<4x256xf32>
    %cst_5 = arith.constant 0.000000e+00 : f32
    %6 = vector.broadcast %cst_5 : f32 to vector<4x256xf32>
    %7 = arith.maximumf %5, %6 : vector<4x256xf32>
    %c0_6 = arith.constant 0 : index
    %c0_7 = arith.constant 0 : index
    %8 = vector.load %arg5[%c0_6, %c0_7] : memref<4x4xf32, #tpu.memory_space<vmem>>, vector<4x4xf32>
    %cst_8 = arith.constant dense<0.000000e+00> : vector<4x256xf32>
    %9 = tpu.matmul %8, %7, %cst_8 {dimension_numbers = #tpu.dot_dimension_numbers<[1], [0], [0], [1], [0, 0, 1, 1], [], []>} : vector<4x4xf32>, vector<4x256xf32>, vector<4x256xf32> -> vector<4x256xf32>
    %10 = arith.subf %7, %9 : vector<4x256xf32>
    %c0_9 = arith.constant 0 : index
    %c0_10 = arith.constant 0 : index
    %11 = vector.load %arg5[%c0_9, %c0_10] : memref<4x4xf32, #tpu.memory_space<vmem>>, vector<4x4xf32>
    %12 = arith.mulf %10, %10 : vector<4x256xf32>
    %cst_11 = arith.constant dense<0.000000e+00> : vector<4x256xf32>
    %13 = tpu.matmul %11, %12, %cst_11 {dimension_numbers = #tpu.dot_dimension_numbers<[1], [0], [0], [1], [0, 0, 1, 1], [], []>} : vector<4x4xf32>, vector<4x256xf32>, vector<4x256xf32> -> vector<4x256xf32>
    %cst_12 = arith.constant 9.99999974E-6 : f32
    %14 = vector.broadcast %cst_12 : f32 to vector<4x256xf32>
    %15 = arith.addf %13, %14 : vector<4x256xf32>
    %16 = math.rsqrt %15 : vector<4x256xf32>
    %17 = arith.mulf %10, %16 : vector<4x256xf32>
    %c0_13 = arith.constant 0 : index
    %c0_14 = arith.constant 0 : index
    %18 = vector.load %arg3[%c0_13, %c0_14] : memref<4x1xf32, #tpu.memory_space<vmem>>, vector<4x1xf32>
    %19 = vector.broadcast %18 : vector<4x1xf32> to vector<4x256xf32>
    %20 = arith.mulf %17, %19 : vector<4x256xf32>
    %c0_15 = arith.constant 0 : index
    %c0_16 = arith.constant 0 : index
    %21 = vector.load %arg4[%c0_15, %c0_16] : memref<4x1xf32, #tpu.memory_space<vmem>>, vector<4x1xf32>
    %22 = vector.broadcast %21 : vector<4x1xf32> to vector<4x256xf32>
    %23 = arith.addf %20, %22 : vector<4x256xf32>
    %c0_17 = arith.constant 0 : index
    %c0_18 = arith.constant 0 : index
    %24 = vector.load %arg6[%c0_17, %c0_18] : memref<3x4xf32, #tpu.memory_space<vmem>>, vector<3x4xf32>
    %cst_19 = arith.constant dense<0.000000e+00> : vector<3x256xf32>
    %25 = tpu.matmul %24, %23, %cst_19 {dimension_numbers = #tpu.dot_dimension_numbers<[1], [0], [0], [1], [0, 0, 1, 1], [], []>} : vector<3x4xf32>, vector<4x256xf32>, vector<3x256xf32> -> vector<3x256xf32>
    %c0_20 = arith.constant 0 : index
    %c0_21 = arith.constant 0 : index
    %26 = vector.load %arg7[%c0_20, %c0_21] : memref<3x1xf32, #tpu.memory_space<vmem>>, vector<3x1xf32>
    %27 = vector.broadcast %26 : vector<3x1xf32> to vector<3x256xf32>
    %28 = arith.addf %25, %27 : vector<3x256xf32>
    %c0_22 = arith.constant 0 : index
    %c0_23 = arith.constant 0 : index
    %29 = vector.load %arg9[%c0_22, %c0_23] : memref<3x256xf32, #tpu.memory_space<vmem>>, vector<3x256xf32>
    tpu.vector_store %arg9[%c0_22, %c0_23], %28 {strides = array<i32>} : memref<3x256xf32, #tpu.memory_space<vmem>>, vector<3x256xf32>,
    return
  }
  func.func @transform_0(%arg0: i32) -> (i32, i32) {
    %c0_i32 = arith.constant 0 : i32
    %c0_i32_0 = arith.constant 0 : i32
    %c0_i32_1 = arith.constant 0 : i32
    return %c0_i32, %c0_i32_0 : i32, i32
  }
  func.func @transform_1(%arg0: i32) -> (i32, i32) {
    %c0_i32 = arith.constant 0 : i32
    %c0_i32_0 = arith.constant 0 : i32
    %c0_i32_1 = arith.constant 0 : i32
    return %c0_i32, %c0_i32_0 : i32, i32
  }
  func.func @transform_2(%arg0: i32) -> (i32, i32) {
    %c0_i32 = arith.constant 0 : i32
    %c0_i32_0 = arith.constant 0 : i32
    %c0_i32_1 = arith.constant 0 : i32
    return %c0_i32, %c0_i32_0 : i32, i32
  }
  func.func @transform_3(%arg0: i32) -> (i32, i32) {
    %c0_i32 = arith.constant 0 : i32
    %c0_i32_0 = arith.constant 0 : i32
    %c0_i32_1 = arith.constant 0 : i32
    return %c0_i32, %c0_i32_0 : i32, i32
  }
  func.func @transform_4(%arg0: i32) -> (i32, i32) {
    %c0_i32 = arith.constant 0 : i32
    %c0_i32_0 = arith.constant 0 : i32
    %c0_i32_1 = arith.constant 0 : i32
    return %c0_i32, %c0_i32_0 : i32, i32
  }
  func.func @transform_5(%arg0: i32) -> (i32, i32) {
    %c0_i32 = arith.constant 0 : i32
    %c0_i32_0 = arith.constant 0 : i32
    %c0_i32_1 = arith.constant 0 : i32
    return %c0_i32, %c0_i32_0 : i32, i32
  }
  func.func @transform_6(%arg0: i32) -> (i32, i32) {
    %c0_i32 = arith.constant 0 : i32
    %c0_i32_0 = arith.constant 0 : i32
    %c0_i32_1 = arith.constant 0 : i32
    return %c0_i32, %c0_i32_0 : i32, i32
  }
  func.func @transform_7(%arg0: i32) -> (i32, i32) {
    %c0_i32 = arith.constant 0 : i32
    %c0_i32_0 = arith.constant 0 : i32
    return %c0_i32, %arg0 : i32, i32
  }
  func.func @transform_8(%arg0: i32) -> (i32, i32) {
    %c0_i32 = arith.constant 0 : i32
    %c0_i32_0 = arith.constant 0 : i32
    return %c0_i32, %arg0 : i32, i32
  }
}

</mosaic_0001>

<bundles_post_ra>
// kernel: ae_forward.19
= control target key start
LH: loop header
LB: loop body
LE: loop exit
PB: predicated region body
PF: predicated region fallthrough
CT: control target
= control target key end

     0   :  { %s652_s21 = smov 0   ;;  %s688_s0 = inlined_call_operand.vmem [shape: f32[8,3], index: 0, kind: input, shape index: {}]   ;;  %s689_s1 = inlined_call_operand.vmem [shape: f32[8,1], index: 1, kind: input, shape index: {}]   ;;  %s690_s2 = inlined_call_operand.vmem [shape: f32[8,1], index: 2, kind: input, shape index: {}]   ;;  %s691_s3 = inlined_call_operand.vmem [shape: f32[8,1], index: 3, kind: input, shape index: {}]   ;;  %s692_s4 = inlined_call_operand.vmem [shape: f32[8,8], index: 4, kind: input, shape index: {}]   ;;  %s693_s5 = inlined_call_operand.vmem [shape: f32[3,512], index: 5, kind: input, shape index: {}]   ;;  %s694_s6 = inlined_call_operand.vmem [shape: f32[8,512], index: 6, kind: output, shape index: {}]  }
   0x1 LB: > { %s574_s22 = sadd.s32 4294967295, %s613_s21   ;;  %p578_p0 = scmp.ge.s32.totalorder %s613_s21, 1  ;;  %s613_s21 = sphi %s652_s21, %s16_s21  }
   0x2   : > { %p213_p1 = scmp.lt.s32.totalorder %s613_s21, 3 }
   0x4   : > { %p214_p2 = pnand %p578_p0, %p213_p1 }
   0x5   : > { %s579_s23 = sshll.u32 (!%p214_p2), %s574_s22, 1 }
   0x6   : > { %217 = sbr.rel (%p214_p2) target bundleno = 637 (0x27d), region = 44  ;;  %p244_p3 = scmp.lt.s32.totalorder (!%p214_p2), %s579_s23, 3 }
   0xb   : > { %v615_v0 = vmov 0.0   ;;  %v616_v1 = vmov 0   ;;  %v257_v2 = vld [vmem:[%s689_s1] sm:$0xff]  ;;  %s696_s23 = smov (!%p244_p3, %s579_s23), 3  ;;  %vm269_vm0 = vcmask 1042432   ;;  %vm265_vm1 = vcmask 23552  }
   0xc   : > { %338 = vmatprep.mubr.f32.mxu0 %v615_v0  ;;  %600 = vset.pattern.permute.xlu0 %v616_v1  ;;  %v500_v3 = vld [vmem:[%s690_s2] sm:$0xff]  ;;  %s580_s28 = sshll.u32 %s696_s23, 2  ;;  %vm346_vm2 = vcmask 64512   ;;  %s582_s14 = sshll.u32 %s696_s23, 3 }
   0xd   : > { %260 = vperm.xlu0 %600, %v257_v2   ;;  %414 = vmatprep.mubr.f32.mxu1 %v615_v0  ;;  %s247_s7 = scalar_lea.vmem %s693_s5, %s580_s28  ;;  %v255_v6 = vld [vmem:[%s688_s0] sm:$0xff]  ;;  %s253_s17 = scalar_lea.vmem %s694_s6, %s582_s14 }
   0xe   : > { %601 = vset.pattern.permute.xlu1 %v616_v1  ;;  %v256_v4 = vld [vmem:[%s247_s7] sm:$0x77] }
   0xf   : > { %v264_v5 = vcombine.high %v256_v4, %v256_v4  ;;  %v345_v12 = vld [vmem:[%s692_s4] sm:$0xff] }
  0x10   : > { %v508_v13 = vld [vmem:[%s691_s3] sm:$0xff] }
  0x11   : > { %503 = vperm.xlu0 %600, %v500_v3   ;;  %583 = vmatprep.subr.msk.mxu0 %vm269_vm0, %v264_v5 }
  0x12   : > { %584 = vmatpush1.msk.msra.mxu0 %vm269_vm0, %v256_v4  ;;  %511 = vperm.xlu1 %601, %v508_v13  }
  0x13   : > { %585 = vmatmul.mubr.msk.f32.vlgmr.msra.gmra.mxu0 %vm265_vm1, %v255_v6 }
  0x14   : > { %489 = vmatprep.mubr.f32.mxu0 %v615_v0 }
  0x88   : > { %v261_v8 = vpop.permute.xlu0 %260 }
  0x8c   : > { %v504_v27 = vpop.permute.xlu0 %503 }
  0x8d   : > { %v512_v28 = vpop.permute.xlu1 %511 }
  0xd3   : > { %v340_v7 = vpop.f32.mrf.mxu0 }
  0xd4   : > { %v341_v11 = vadd.f32 %v340_v7, %v261_v8 }
  0xd5   : > { %v342_v9 = vpop.f32.mrf.mxu0 }
  0xd6   : > { %v343_v10 = vadd.f32 %v342_v9, %v261_v8 }
  0xd8   : > { %380 = vmatprep.subr.mxu1 %v343_v10 }
  0xd9   : > { %381 = vmatpush1.msra.mxu1 %v341_v11 }
  0xda   : > { %586 = vmatmul.mubr.msk.f32.vlgmr.msra.gmra.mxu1 %vm346_vm2, %v345_v12 }
 0x19a   : > { %v416_v14 = vpop.f32.mrf.mxu1 }
 0x19b   : > { %v421_v15 = vsub.f32 %v341_v11, %v416_v14 }
 0x19c   : > { %v418_v16 = vpop.f32.mrf.mxu1 }
 0x19d   : > { %v422_v17 = vsub.f32 %v343_v10, %v418_v16  ;;  %v423_v19 = vmul.f32 %v421_v15, %v421_v15 }
 0x19f   : > { %v424_v18 = vmul.f32 %v422_v17, %v422_v17 }
 0x1a1   : > { %455 = vmatprep.subr.mxu0 %v424_v18 }
 0x1a2   : > { %456 = vmatpush1.msra.mxu0 %v423_v19 }
 0x1a3   : > { %587 = vmatmul.mubr.msk.f32.vlgmr.msra.gmra.mxu0 %vm346_vm2, %v345_v12 }
 0x263   : > { %v491_v20 = vpop.f32.mrf.mxu0 }
 0x264   : > { %v492_v21 = vadd.f32 1e-05, %v491_v20 }
 0x265   : > { %v493_v22 = vpop.f32.mrf.mxu0 }
 0x266   : > { %603 = vrsqrt.f32 %v492_v21  ;;  %v494_v23 = vadd.f32 1e-05, %v493_v22 }
 0x268   : > { %605 = vrsqrt.f32 %v494_v23 }
 0x273   : > { %v604_v24 = vpop.eup %603 }
 0x274   : > { %v498_v25 = vmul.f32 %v604_v24, %v421_v15 }
 0x275   : > { %v606_v26 = vpop.eup %605 }
 0x276   : > { %v499_v29 = vmul.f32 %v606_v26, %v422_v17  ;;  %v506_v30 = vmul.f32 %v504_v27, %v498_v25 }
 0x278   : > { %v507_v31 = vmul.f32 %v504_v27, %v499_v29  ;;  %v514_v32 = vadd.f32 %v512_v28, %v506_v30 }
 0x27a   : > { %v515_v33 = vadd.f32 %v512_v28, %v507_v31  ;;  %516 = vst [vmem:[%s253_s17] sm:$0xff] %v514_v32 }
 0x27c   : > { %517 = vst [vmem:[%s253_s17 + $0x8] sm:$0xff] %v515_v33 }
 0x27d PF: > { %s16_s21 = sadd.s32 1, %s613_s21  }
 0x27e   : > { %p13_p4 = scmp.ge.s32.totalorder %s16_s21, 4  }
 0x280   :  { %15 = sbr.rel (!%p13_p4) target bundleno = 1 (0x1), region = 74 }

// kernel: ae_forward.20
= control target key start
LH: loop header
LB: loop body
LE: loop exit
PB: predicated region body
PF: predicated region fallthrough
CT: control target
= control target key end

     0   :  { %s481_s12 = smov 0   ;;  %s483_s13 = smov 0   ;;  %s579_s0 = inlined_call_operand.vmem [shape: f32[8,72], index: 0, kind: input, shape index: {}]   ;;  %s580_s1 = inlined_call_operand.vmem [shape: f32[8,1], index: 1, kind: input, shape index: {}]   ;;  %s581_s2 = inlined_call_operand.vmem [shape: f32[72,512], index: 2, kind: input, shape index: {}]   ;;  %s582_s3 = inlined_call_operand.vmem [shape: f32[8,512], index: 3, kind: output, shape index: {}]  }
   0x1   :  { %s485_s14 = smov 0  }
   0x2 LB: > { %s393_s15 = sadd.s32 4294967295, %s457_s14   ;;  %s498_s16 = sadd.s32 1, %s457_s14   ;;  %s457_s14 = sphi %s485_s14, %s585_s14   ;;  %s453_s13 = sphi %s483_s13, %s584_s13   ;;  %s449_s12 = sphi %s481_s12, %s583_s12  }
   0x3   : > { %s59_s17 = ssub.s32 %s457_s14, %s498_s16  ;;  %s62_s18 = sadd.s32 1, %s453_s13 }
   0x4   : > { %p60_p0 = scmp.eq.s32.totalorder %s59_s17, 0  ;;  %p69_p1 = scmp.ne.s32.totalorder %s453_s13, %s449_s12 }
   0x5   : > { %p70_p2 = scmp.eq.s32.totalorder %s457_s14, 0  ;;  %p396_p4 = scmp.ge.s32.totalorder %s457_s14, 2 }
   0x6   : > { %s507_s19 = scalar_select %p60_p0, %s453_s13, %s62_s18  }
   0x7   : > { %p71_p3 = por %p70_p2, %p69_p1  ;;  %127 = sbr.rel (%p396_p4) target bundleno = 25 (0x19), region = 24 }
   0xc   : > { %130 = sbr.rel (!%p71_p3) target bundleno = 25 (0x19), region = 28  ;;  %s132_s20 = sand.u32 (%p71_p3), 1, %s453_s13  }
   0xd   : > { %s405_s21 = sshll.u32 (%p71_p3), %s457_s14, 4  ;;  %s406_s22 = smul.u32 (%p71_p3), 144, %s132_s20 }
   0xe   : > { %s515_s25 = scalar_lea.vmem (%p71_p3), %s581_s2, %s405_s21 }
   0xf   : > { %v150_v0 = vld [vmem:[%s515_s25] sm:$0xff] (%p71_p3)  ;;  %v152_v1 = vld [vmem:[%s515_s25 + $0x8] sm:$0xff] (%p71_p3)  ;;  %s134_s26 = scalar_lea.vmem (%p71_p3), [#allocation2], %s406_s22 }
  0x10   : > { %v154_v2 = vld [vmem:[%s515_s25 + $0x20] sm:$0xff] (%p71_p3)  ;;  %v156_v3 = vld [vmem:[%s515_s25 + $0x28] sm:$0xff] (%p71_p3)  ;;  %151 = vst [vmem:[%s134_s26] sm:$0xff] (%p71_p3), %v150_v0  ;;  %153 = vst [vmem:[%s134_s26 + $0x8] sm:$0xff] (%p71_p3), %v152_v1 }
  0x11   : > { %v158_v4 = vld [vmem:[%s515_s25 + $0x40] sm:$0xff]  ;;  %v160_v5 = vld [vmem:[%s515_s25 + $0x48] sm:$0xff]  ;;  %155 = vst [vmem:[%s134_s26 + $0x10] sm:$0xff] %v154_v2  ;;  %157 = vst [vmem:[%s134_s26 + $0x18] sm:$0xff] %v156_v3 }
  0x12   : > { %159 = vst [vmem:[%s134_s26 + $0x20] sm:$0xff] %v158_v4  ;;  %161 = vst [vmem:[%s134_s26 + $0x28] sm:$0xff] %v160_v5  ;;  %v162_v6 = vld [vmem:[%s515_s25 + $0x60] sm:$0xff]  ;;  %v164_v7 = vld [vmem:[%s515_s25 + $0x68] sm:$0xff] }
  0x13   : > { %v166_v8 = vld [vmem:[%s515_s25 + $0x80] sm:$0xff]  ;;  %163 = vst [vmem:[%s134_s26 + $0x30] sm:$0xff] %v162_v6  ;;  %165 = vst [vmem:[%s134_s26 + $0x38] sm:$0xff] %v164_v7  ;;  %v168_v9 = vld [vmem:[%s515_s25 + $0x88] sm:$0xff] }
  0x14   : > { %167 = vst [vmem:[%s134_s26 + $0x40] sm:$0xff] %v166_v8  ;;  %v170_v10 = vld [vmem:[%s515_s25 + $0xa0] sm:$0xff]  ;;  %v172_v11 = vld [vmem:[%s515_s25 + $0xa8] sm:$0xff]  ;;  %169 = vst [vmem:[%s134_s26 + $0x48] sm:$0xff] %v168_v9 }
  0x15   : > { %171 = vst [vmem:[%s134_s26 + $0x50] sm:$0xff] %v170_v10  ;;  %173 = vst [vmem:[%s134_s26 + $0x58] sm:$0xff] %v172_v11  ;;  %v174_v12 = vld [vmem:[%s515_s25 + $0xc0] sm:$0xff]  ;;  %v176_v13 = vld [vmem:[%s515_s25 + $0xc8] sm:$0xff] }
  0x16   : > { %v178_v14 = vld [vmem:[%s515_s25 + $0xe0] sm:$0xff]  ;;  %175 = vst [vmem:[%s134_s26 + $0x60] sm:$0xff] %v174_v12  ;;  %177 = vst [vmem:[%s134_s26 + $0x68] sm:$0xff] %v176_v13  ;;  %v180_v15 = vld [vmem:[%s515_s25 + $0xe8] sm:$0xff] }
  0x17   : > { %179 = vst [vmem:[%s134_s26 + $0x70] sm:$0xff] %v178_v14  ;;  %v182_v16 = vld [vmem:[%s515_s25 + $0x100] sm:$0xff]  ;;  %v184_v17 = vld [vmem:[%s515_s25 + $0x108] sm:$0xff]  ;;  %181 = vst [vmem:[%s134_s26 + $0x78] sm:$0xff] %v180_v15 }
  0x18   : > { %183 = vst [vmem:[%s134_s26 + $0x80] sm:$0xff] %v182_v16  ;;  %185 = vst [vmem:[%s134_s26 + $0x88] sm:$0xff] %v184_v17 }
  0x19 PF: > { %p399_p5 = scmp.ge.s32.totalorder %s457_s14, 1  ;;  %p190_p6 = scmp.lt.s32.totalorder %s457_s14, 3 }
  0x1b   : > { %p191_p7 = pnand %p399_p5, %p190_p6 }
  0x1c   : > { %s197_s27 = sand.u32 (!%p191_p7), 1, %s449_s12   ;;  %s400_s7 = sshll.u32 (!%p191_p7), %s393_s15, 1 }
  0x1d   : > { %194 = sbr.rel (%p191_p7) target bundleno = 254 (0xfe), region = 51  ;;  %p222_p8 = scmp.lt.s32.totalorder (!%p191_p7), %s400_s7, 3 }
  0x1e   : > { %s407_s30 = smul.u32 (!%p191_p7), 144, %s197_s27 }
  0x20   : > { %s541_s4 = scalar_lea.vmem (!%p191_p7), [#allocation2], %s407_s30 }
  0x22   : > { %v246_v18 = vld [vmem:[%s580_s1] sm:$0xff]  ;;  %v459_v19 = vmov 0.0   ;;  %v460_v20 = vmov 0   ;;  %v245_v21 = vld [vmem:[%s541_s4 + $0x88] sm:$0xff]  ;;  %v243_v23 = vld [vmem:[%s541_s4 + $0x78] sm:$0xff]  ;;  %vm252_vm0 = vcmask 588800  }
  0x23   : > { %320 = vmatprep.mubr.f32.mxu0 %v459_v19  ;;  %434 = vset.pattern.permute.xlu0 %v460_v20  ;;  %v244_v22 = vld [vmem:[%s541_s4 + $0x80] sm:$0xff]  ;;  %v242_v24 = vld [vmem:[%s541_s4 + $0x70] sm:$0xff]  ;;  %v241_v25 = vld [vmem:[%s541_s4 + $0x68] sm:$0xff]  ;;  %s587_s7 = smov (!%p222_p8, %s400_s7), 3 }
  0x24   : > { %249 = vperm.xlu0 %434, %v246_v18   ;;  %270 = vmatprep.subr.mxu0 %v245_v21  ;;  %v240_v26 = vld [vmem:[%s541_s4 + $0x60] sm:$0xff]  ;;  %v239_v27 = vld [vmem:[%s541_s4 + $0x58] sm:$0xff]  ;;  %v238_v28 = vld [vmem:[%s541_s4 + $0x50] sm:$0xff]  ;;  %s401_s8 = sshll.u32 %s587_s7, 3 }
  0x25   : > { %271 = vmatpush1.msra.mxu0 %v244_v22  ;;  %v237_v29 = vld [vmem:[%s541_s4 + $0x48] sm:$0xff]  ;;  %v236_v30 = vld [vmem:[%s541_s4 + $0x40] sm:$0xff]  ;;  %v235_v31 = vld [vmem:[%s541_s4 + $0x38] sm:$0xff]  ;;  %s225_s11 = scalar_lea.vmem %s582_s3, %s401_s8 }
  0x26   : > { %272 = vmatprep.subr.mxu0 %v243_v23  ;;  %v234_v32 = vld [vmem:[%s541_s4 + $0x30] sm:$0xff]  ;;  %v233_v33 = vld [vmem:[%s541_s4 + $0x28] sm:$0xff]  ;;  %v232_v34 = vld [vmem:[%s541_s4 + $0x20] sm:$0xff] }
  0x27   : > { %273 = vmatpush1.msra.mxu0 %v242_v24  ;;  %v231_v35 = vld [vmem:[%s541_s4 + $0x18] sm:$0xff]  ;;  %v230_v36 = vld [vmem:[%s541_s4 + $0x10] sm:$0xff]  ;;  %v229_v37 = vld [vmem:[%s541_s4 + $0x8] sm:$0xff] }
  0x28   : > { %274 = vmatprep.subr.mxu0 %v241_v25  ;;  %v228_v38 = vld [vmem:[%s541_s4] sm:$0xff] }
  0x29   : > { %275 = vmatpush1.msra.mxu0 %v240_v26  ;;  %v227_v39 = vld [vmem:[%s579_s0] sm:$0xff] }
  0x2a   : > { %276 = vmatprep.subr.mxu0 %v239_v27 }
  0x2b   : > { %277 = vmatpush1.msra.mxu0 %v238_v28 }
  0x2c   : > { %278 = vmatprep.subr.mxu0 %v237_v29 }
  0x2d   : > { %279 = vmatpush1.msra.mxu0 %v236_v30 }
  0x2e   : > { %280 = vmatprep.subr.mxu0 %v235_v31 }
  0x2f   : > { %281 = vmatpush1.msra.mxu0 %v234_v32 }
  0x30   : > { %282 = vmatprep.subr.mxu0 %v233_v33 }
  0x31   : > { %283 = vmatpush1.msra.mxu0 %v232_v34 }
  0x32   : > { %284 = vmatprep.subr.mxu0 %v231_v35 }
  0x33   : > { %285 = vmatpush1.msra.mxu0 %v230_v36 }
  0x34   : > { %286 = vmatprep.subr.mxu0 %v229_v37 }
  0x35   : > { %287 = vmatpush1.msra.mxu0 %v228_v38 }
  0x36   : > { %402 = vmatmul.mubr.msk.f32.vlgmr.msra.gmra.mxu0 %vm252_vm0, %v227_v39 }
  0x9f   : > { %v250_v40 = vpop.permute.xlu0 %249 }
  0xf6   : > { %v322_v41 = vpop.f32.mrf.mxu0 }
  0xf7   : > { %v323_v42 = vadd.f32 %v322_v41, %v250_v40 }
  0xf8   : > { %v324_v43 = vpop.f32.mrf.mxu0 }
  0xf9   : > { %v327_v44 = vmax.f32 %v323_v42, 0.0  ;;  %v325_v45 = vadd.f32 %v324_v43, %v250_v40 }
  0xfb   : > { %329 = vst [vmem:[%s225_s11] sm:$0xff] %v327_v44  ;;  %v328_v46 = vmax.f32 %v325_v45, 0.0 }
  0xfd   : > { %330 = vst [vmem:[%s225_s11 + $0x8] sm:$0xff] %v328_v46 }
  0xfe PF: > { %p10_p9 = scmp.ge.s32.totalorder %s498_s16, 4   ;;  %s583_s12 = smov %s453_s13 }
  0xff   : > { %s584_s13 = smov %s507_s19  ;;  %s585_s14 = smov %s498_s16 }
 0x100   :  { %12 = sbr.rel (!%p10_p9) target bundleno = 2 (0x2), region = 90 }

// kernel: ae_forward.22
= control target key start
LH: loop header
LB: loop body
LE: loop exit
PB: predicated region body
PF: predicated region fallthrough
CT: control target
= control target key end

     0   :  { %s808_s24 = smov 0   ;;  %s810_s25 = smov 0   ;;  %s918_s0 = inlined_call_operand.vmem [shape: f32[8,72], index: 0, kind: input, shape index: {}]   ;;  %s919_s1 = inlined_call_operand.vmem [shape: f32[8,1], index: 1, kind: input, shape index: {}]   ;;  %s920_s2 = inlined_call_operand.vmem [shape: f32[8,8], index: 2, kind: input, shape index: {}]   ;;  %s921_s3 = inlined_call_operand.vmem [shape: f32[8,8], index: 3, kind: input, shape index: {}]   ;;  %s922_s4 = inlined_call_operand.vmem [shape: f32[8,1], index: 4, kind: input, shape index: {}]   ;;  %s923_s5 = inlined_call_operand.vmem [shape: f32[72,512], index: 5, kind: input, shape index: {}]   ;;  %s924_s6 = inlined_call_operand.vmem [shape: f32[8,512], index: 6, kind: input, shape index: {}]   ;;  %s925_s7 = inlined_call_operand.vmem [shape: f32[8,512], index: 7, kind: output, shape index: {}]  }
   0x1   :  { %s812_s26 = smov 0  }
   0x2 LB: > { %s696_s27 = sadd.s32 4294967295, %s764_s26   ;;  %s825_s28 = sadd.s32 1, %s764_s26   ;;  %s764_s26 = sphi %s812_s26, %s928_s26   ;;  %s760_s25 = sphi %s810_s25, %s927_s25   ;;  %s756_s24 = sphi %s808_s24, %s926_s24  }
   0x3   : > { %s126_s29 = ssub.s32 %s764_s26, %s825_s28  ;;  %s129_s30 = sadd.s32 1, %s760_s25 }
   0x4   : > { %p127_p0 = scmp.eq.s32.totalorder %s126_s29, 0  ;;  %p136_p1 = scmp.ne.s32.totalorder %s760_s25, %s756_s24 }
   0x5   : > { %p137_p2 = scmp.eq.s32.totalorder %s764_s26, 0  ;;  %p699_p4 = scmp.ge.s32.totalorder %s764_s26, 2 }
   0x6   : > { %s834_s8 = scalar_select %p127_p0, %s760_s25, %s129_s30  }
   0x7   : > { %p138_p3 = por %p137_p2, %p136_p1  ;;  %229 = sbr.rel (%p699_p4) target bundleno = 25 (0x19), region = 36 }
   0xc   : > { %232 = sbr.rel (!%p138_p3) target bundleno = 25 (0x19), region = 40  ;;  %s234_s9 = sand.u32 (%p138_p3), 1, %s760_s25  }
   0xd   : > { %s712_s10 = sshll.u32 (%p138_p3), %s764_s26, 4  ;;  %s713_s11 = smul.u32 (%p138_p3), 144, %s234_s9 }
   0xe   : > { %s842_s14 = scalar_lea.vmem (%p138_p3), %s923_s5, %s712_s10 }
   0xf   : > { %v252_v0 = vld [vmem:[%s842_s14] sm:$0xff] (%p138_p3)  ;;  %v254_v1 = vld [vmem:[%s842_s14 + $0x8] sm:$0xff] (%p138_p3)  ;;  %s236_s15 = scalar_lea.vmem (%p138_p3), [#allocation2], %s713_s11 }
  0x10   : > { %v256_v2 = vld [vmem:[%s842_s14 + $0x20] sm:$0xff] (%p138_p3)  ;;  %v258_v3 = vld [vmem:[%s842_s14 + $0x28] sm:$0xff] (%p138_p3)  ;;  %253 = vst [vmem:[%s236_s15] sm:$0xff] (%p138_p3), %v252_v0  ;;  %255 = vst [vmem:[%s236_s15 + $0x8] sm:$0xff] (%p138_p3), %v254_v1 }
  0x11   : > { %v260_v4 = vld [vmem:[%s842_s14 + $0x40] sm:$0xff]  ;;  %v262_v5 = vld [vmem:[%s842_s14 + $0x48] sm:$0xff]  ;;  %257 = vst [vmem:[%s236_s15 + $0x10] sm:$0xff] %v256_v2  ;;  %259 = vst [vmem:[%s236_s15 + $0x18] sm:$0xff] %v258_v3 }
  0x12   : > { %261 = vst [vmem:[%s236_s15 + $0x20] sm:$0xff] %v260_v4  ;;  %263 = vst [vmem:[%s236_s15 + $0x28] sm:$0xff] %v262_v5  ;;  %v264_v6 = vld [vmem:[%s842_s14 + $0x60] sm:$0xff]  ;;  %v266_v7 = vld [vmem:[%s842_s14 + $0x68] sm:$0xff] }
  0x13   : > { %v268_v8 = vld [vmem:[%s842_s14 + $0x80] sm:$0xff]  ;;  %265 = vst [vmem:[%s236_s15 + $0x30] sm:$0xff] %v264_v6  ;;  %267 = vst [vmem:[%s236_s15 + $0x38] sm:$0xff] %v266_v7  ;;  %v270_v9 = vld [vmem:[%s842_s14 + $0x88] sm:$0xff] }
  0x14   : > { %269 = vst [vmem:[%s236_s15 + $0x40] sm:$0xff] %v268_v8  ;;  %v272_v10 = vld [vmem:[%s842_s14 + $0xa0] sm:$0xff]  ;;  %v274_v11 = vld [vmem:[%s842_s14 + $0xa8] sm:$0xff]  ;;  %271 = vst [vmem:[%s236_s15 + $0x48] sm:$0xff] %v270_v9 }
  0x15   : > { %273 = vst [vmem:[%s236_s15 + $0x50] sm:$0xff] %v272_v10  ;;  %275 = vst [vmem:[%s236_s15 + $0x58] sm:$0xff] %v274_v11  ;;  %v276_v12 = vld [vmem:[%s842_s14 + $0xc0] sm:$0xff]  ;;  %v278_v13 = vld [vmem:[%s842_s14 + $0xc8] sm:$0xff] }
  0x16   : > { %v280_v14 = vld [vmem:[%s842_s14 + $0xe0] sm:$0xff]  ;;  %277 = vst [vmem:[%s236_s15 + $0x60] sm:$0xff] %v276_v12  ;;  %279 = vst [vmem:[%s236_s15 + $0x68] sm:$0xff] %v278_v13  ;;  %v282_v15 = vld [vmem:[%s842_s14 + $0xe8] sm:$0xff] }
  0x17   : > { %281 = vst [vmem:[%s236_s15 + $0x70] sm:$0xff] %v280_v14  ;;  %v284_v16 = vld [vmem:[%s842_s14 + $0x100] sm:$0xff]  ;;  %v286_v17 = vld [vmem:[%s842_s14 + $0x108] sm:$0xff]  ;;  %283 = vst [vmem:[%s236_s15 + $0x78] sm:$0xff] %v282_v15 }
  0x18   : > { %285 = vst [vmem:[%s236_s15 + $0x80] sm:$0xff] %v284_v16  ;;  %287 = vst [vmem:[%s236_s15 + $0x88] sm:$0xff] %v286_v17 }
  0x19 PF: > { %p702_p5 = scmp.ge.s32.totalorder %s764_s26, 1  ;;  %p301_p6 = scmp.lt.s32.totalorder %s764_s26, 3 }
  0x1b   : > { %p302_p7 = pnand %p702_p5, %p301_p6 }
  0x1c   : > { %s308_s16 = sand.u32 (!%p302_p7), 1, %s756_s24   ;;  %s703_s29 = sshll.u32 (!%p302_p7), %s696_s27, 1 }
  0x1d   : > { %305 = sbr.rel (%p302_p7) target bundleno = 456 (0x1c8), region = 67  ;;  %p346_p8 = scmp.lt.s32.totalorder (!%p302_p7), %s703_s29, 3 }
  0x1e   : > { %s714_s19 = smul.u32 (!%p302_p7), 144, %s308_s16 }
  0x20   : > { %s871_s22 = scalar_lea.vmem (!%p302_p7), [#allocation2], %s714_s19 }
  0x22   : > { %v376_v18 = vld [vmem:[%s919_s1] sm:$0xff]  ;;  %v766_v19 = vmov 0.0   ;;  %v767_v20 = vmov 0   ;;  %v375_v22 = vld [vmem:[%s871_s22 + $0x88] sm:$0xff]  ;;  %v373_v24 = vld [vmem:[%s871_s22 + $0x78] sm:$0xff]  ;;  %vm382_vm0 = vcmask 588800  }
  0x23   : > { %450 = vmatprep.mubr.f32.mxu0 %v766_v19  ;;  %741 = vset.pattern.permute.xlu0 %v767_v20  ;;  %v612_v21 = vld [vmem:[%s922_s4] sm:$0xff]  ;;  %v371_v26 = vld [vmem:[%s871_s22 + $0x68] sm:$0xff]  ;;  %v369_v28 = vld [vmem:[%s871_s22 + $0x58] sm:$0xff]  ;;  %s930_s29 = smov (!%p346_p8, %s703_s29), 3  ;;  %vm463_vm1 = vcmask 64512  }
  0x24   : > { %379 = vperm.xlu0 %741, %v376_v18   ;;  %531 = vmatprep.mubr.f32.mxu1 %v766_v19  ;;  %v374_v23 = vld [vmem:[%s871_s22 + $0x80] sm:$0xff]  ;;  %v372_v25 = vld [vmem:[%s871_s22 + $0x70] sm:$0xff]  ;;  %v367_v30 = vld [vmem:[%s871_s22 + $0x48] sm:$0xff]  ;;  %s704_s30 = sshll.u32 %s930_s29, 3 }
  0x25   : > { %400 = vmatprep.subr.mxu0 %v375_v22  ;;  %v370_v27 = vld [vmem:[%s871_s22 + $0x60] sm:$0xff]  ;;  %v368_v29 = vld [vmem:[%s871_s22 + $0x50] sm:$0xff]  ;;  %v365_v32 = vld [vmem:[%s871_s22 + $0x38] sm:$0xff]  ;;  %s349_s11 = scalar_lea.vmem %s924_s6, %s704_s30  ;;  %s355_s16 = scalar_lea.vmem %s925_s7, %s704_s30 }
  0x26   : > { %401 = vmatpush1.msra.mxu0 %v374_v23  ;;  %v366_v31 = vld [vmem:[%s871_s22 + $0x40] sm:$0xff]  ;;  %v364_v33 = vld [vmem:[%s871_s22 + $0x30] sm:$0xff]  ;;  %v363_v34 = vld [vmem:[%s871_s22 + $0x28] sm:$0xff] }
  0x27   : > { %402 = vmatprep.subr.mxu0 %v373_v24  ;;  %v362_v35 = vld [vmem:[%s871_s22 + $0x20] sm:$0xff]  ;;  %v361_v36 = vld [vmem:[%s871_s22 + $0x18] sm:$0xff]  ;;  %v360_v37 = vld [vmem:[%s871_s22 + $0x10] sm:$0xff] }
  0x28   : > { %615 = vperm.xlu0 %741, %v612_v21   ;;  %403 = vmatpush1.msra.mxu0 %v372_v25  ;;  %v359_v38 = vld [vmem:[%s871_s22 + $0x8] sm:$0xff]  ;;  %v358_v39 = vld [vmem:[%s871_s22] sm:$0xff] }
  0x29   : > { %404 = vmatprep.subr.mxu0 %v371_v26  ;;  %v357_v40 = vld [vmem:[%s918_s0] sm:$0xff]  ;;  %v462_v41 = vld [vmem:[%s349_s11 + $0x8] sm:$0xff] }
  0x2a   : > { %405 = vmatpush1.msra.mxu0 %v370_v27  ;;  %497 = vmatprep.subr.mxu1 %v462_v41  ;;  %v461_v42 = vld [vmem:[%s349_s11] sm:$0xff] }
  0x2b   : > { %406 = vmatprep.subr.mxu0 %v369_v28  ;;  %498 = vmatpush1.msra.mxu1 %v461_v42  ;;  %v460_v43 = vld [vmem:[%s921_s3] sm:$0xff] }
  0x2c   : > { %407 = vmatpush1.msra.mxu0 %v368_v29  ;;  %708 = vmatmul.mubr.msk.f32.vlgmr.msra.gmra.mxu1 %vm463_vm1, %v460_v43  ;;  %v459_v51 = vld [vmem:[%s920_s2] sm:$0xff] }
  0x2d   : > { %408 = vmatprep.subr.mxu0 %v367_v30  ;;  %605 = vmatprep.mubr.f32.mxu1 %v766_v19 }
  0x2e   : > { %409 = vmatpush1.msra.mxu0 %v366_v31 }
  0x2f   : > { %410 = vmatprep.subr.mxu0 %v365_v32 }
  0x30   : > { %411 = vmatpush1.msra.mxu0 %v364_v33 }
  0x31   : > { %412 = vmatprep.subr.mxu0 %v363_v34 }
  0x32   : > { %413 = vmatpush1.msra.mxu0 %v362_v35 }
  0x33   : > { %414 = vmatprep.subr.mxu0 %v361_v36 }
  0x34   : > { %415 = vmatpush1.msra.mxu0 %v360_v37 }
  0x35   : > { %416 = vmatprep.subr.mxu0 %v359_v38 }
  0x36   : > { %417 = vmatpush1.msra.mxu0 %v358_v39 }
  0x37   : > { %707 = vmatmul.mubr.msk.f32.vlgmr.msra.gmra.mxu0 %vm382_vm0, %v357_v40 }
  0x9f   : > { %v380_v45 = vpop.permute.xlu0 %379 }
  0xa3   : > { %v616_v56 = vpop.permute.xlu0 %615 }
  0xec   : > { %v533_v52 = vpop.f32.mrf.mxu1 }
  0xee   : > { %v535_v53 = vpop.f32.mrf.mxu1 }
  0xf7   : > { %v452_v44 = vpop.f32.mrf.mxu0 }
  0xf8   : > { %v453_v46 = vadd.f32 %v452_v44, %v380_v45 }
  0xf9   : > { %v454_v47 = vpop.f32.mrf.mxu0 }
  0xfa   : > { %v455_v48 = vadd.f32 %v454_v47, %v380_v45  ;;  %v457_v50 = vmax.f32 %v453_v46, 0.0 }
  0xfc   : > { %v458_v49 = vmax.f32 %v455_v48, 0.0 }
  0xfe   : > { %571 = vmatprep.subr.mxu1 %v458_v49 }
  0xff   : > { %572 = vmatpush1.msra.mxu1 %v457_v50 }
 0x100   : > { %709 = vmatmul.mubr.msk.f32.vlgmr.msra.gmra.mxu1 %vm463_vm1, %v459_v51 }
 0x1c0   : > { %v607_v54 = vpop.f32.mrf.mxu1 }
 0x1c1   : > { %v608_v55 = vadd.f32 %v607_v54, %v533_v52 }
 0x1c2   : > { %v609_v57 = vpop.f32.mrf.mxu1 }
 0x1c3   : > { %v618_v58 = vadd.f32 %v616_v56, %v608_v55  ;;  %v610_v59 = vadd.f32 %v609_v57, %v535_v53 }
 0x1c5   : > { %620 = vst [vmem:[%s355_s16] sm:$0xff] %v618_v58  ;;  %v619_v60 = vadd.f32 %v616_v56, %v610_v59 }
 0x1c7   : > { %621 = vst [vmem:[%s355_s16 + $0x8] sm:$0xff] %v619_v60 }
 0x1c8 PF: > { %p14_p9 = scmp.ge.s32.totalorder %s825_s28, 4   ;;  %s926_s24 = smov %s760_s25 }
 0x1c9   : > { %s927_s25 = smov %s834_s8  ;;  %s928_s26 = smov %s825_s28 }
 0x1ca   :  { %16 = sbr.rel (!%p14_p9) target bundleno = 2 (0x2), region = 109 }

// kernel: ae_forward.23
= control target key start
LH: loop header
LB: loop body
LE: loop exit
PB: predicated region body
PF: predicated region fallthrough
CT: control target
= control target key end

     0   :  { %v360_v0 = vmov 0.0   ;;  %vm361_vm0 = vmmov 0   ;;  %v362_v3 = vmov 0   ;;  %vm118_vm1 = vcmask 64512   ;;  %s488_s5 = inlined_call_operand.vmem [shape: f32[128,128], index: 5, kind: input, shape index: {}]   ;;  %s489_s1 = inlined_call_operand.vmem [shape: f32[8,1], index: 1, kind: input, shape index: {}]   ;;  %s490_s2 = inlined_call_operand.vmem [shape: f32[8,1], index: 2, kind: input, shape index: {}]   ;;  %s491_s0 = inlined_call_operand.vmem [shape: f32[8,128], index: 0, kind: input, shape index: {}]   ;;  %s492_s4 = inlined_call_operand.vmem [shape: f32[8,8], index: 4, kind: input, shape index: {}]   ;;  %s493_s3 = inlined_call_operand.vmem [shape: f32[8,1], index: 3, kind: input, shape index: {}]   ;;  %s494_s6 = inlined_call_operand.vmem [shape: f32[8,128], index: 6, kind: output, shape index: {}]  }
   0x1   :  { %308 = vmatprep.subr.mxu0 %v360_v0  ;;  %v39_v1 = vld [vmem:[%s488_s5 + $0x78] sm:$0xff]  ;;  %v38_v2 = vld [vmem:[%s488_s5 + $0x70] sm:$0xff]  ;;  %340 = vmatprep.mubr.msk.f32.mxu0 %vm361_vm0, %v360_v0  ;;  %v37_v4 = vld [vmem:[%s488_s5 + $0x68] sm:$0xff] }
   0x2   :  { %309 = vmatpush3.msra.mxu0 %v39_v1  ;;  %356 = vset.pattern.permute.xlu0 %v362_v3  ;;  %v36_v5 = vld [vmem:[%s488_s5 + $0x60] sm:$0xff]  ;;  %v35_v7 = vld [vmem:[%s488_s5 + $0x58] sm:$0xff]  ;;  %v34_v9 = vld [vmem:[%s488_s5 + $0x50] sm:$0xff] }
   0x3   :  { %310 = vmatprep.subr.mxu0 %v360_v0  ;;  %343 = vmatprep.subr.mxu1 %v360_v0  ;;  %v40_v6 = vld [vmem:[%s489_s1] sm:$0xff]  ;;  %v33_v10 = vld [vmem:[%s488_s5 + $0x48] sm:$0xff]  ;;  %v31_v12 = vld [vmem:[%s488_s5 + $0x38] sm:$0xff] }
   0x4   :  { %311 = vmatpush3.msra.mxu0 %v38_v2  ;;  %345 = vmatprep.mubr.msk.f32.mxu1 %vm361_vm0, %v360_v0  ;;  %v266_v8 = vld [vmem:[%s490_s2] sm:$0xff]  ;;  %v30_v13 = vld [vmem:[%s488_s5 + $0x30] sm:$0xff]  ;;  %v29_v14 = vld [vmem:[%s488_s5 + $0x28] sm:$0xff] }
   0x5   :  { %312 = vmatprep.subr.mxu0 %v360_v0  ;;  %357 = vset.pattern.permute.xlu1 %v362_v3  ;;  %v32_v11 = vld [vmem:[%s488_s5 + $0x40] sm:$0xff]  ;;  %v27_v16 = vld [vmem:[%s488_s5 + $0x18] sm:$0xff]  ;;  %v26_v17 = vld [vmem:[%s488_s5 + $0x10] sm:$0xff] }
   0x6   :  { %313 = vmatpush3.msra.mxu0 %v37_v4  ;;  %43 = vperm.xlu0 %356, %v40_v6   ;;  %v28_v15 = vld [vmem:[%s488_s5 + $0x20] sm:$0xff]  ;;  %v25_v18 = vld [vmem:[%s488_s5 + $0x8] sm:$0xff] }
   0x7   :  { %314 = vmatprep.subr.mxu0 %v360_v0  ;;  %v24_v19 = vld [vmem:[%s488_s5] sm:$0xff] }
   0x8   :  { %315 = vmatpush3.msra.mxu0 %v36_v5  ;;  %v23_v20 = vld [vmem:[%s491_s0] sm:$0xff] }
   0x9   :  { %316 = vmatprep.subr.mxu0 %v360_v0  ;;  %v117_v26 = vld [vmem:[%s492_s4] sm:$0xff] }
   0xa   :  { %317 = vmatpush3.msra.mxu0 %v35_v7  ;;  %269 = vperm.xlu0 %356, %v266_v8   ;;  %v273_v27 = vld [vmem:[%s493_s3] sm:$0xff] }
   0xb   :  { %318 = vmatprep.subr.mxu0 %v360_v0  ;;  %276 = vperm.xlu1 %357, %v273_v27  }
   0xc   :  { %319 = vmatpush3.msra.mxu0 %v34_v9 }
   0xd   :  { %320 = vmatprep.subr.mxu0 %v360_v0 }
   0xe   :  { %321 = vmatpush3.msra.mxu0 %v33_v10 }
   0xf   :  { %322 = vmatprep.subr.mxu0 %v360_v0 }
  0x10   :  { %323 = vmatpush3.msra.mxu0 %v32_v11 }
  0x11   :  { %324 = vmatprep.subr.mxu0 %v360_v0 }
  0x12   :  { %325 = vmatpush3.msra.mxu0 %v31_v12 }
  0x13   :  { %326 = vmatprep.subr.mxu0 %v360_v0 }
  0x14   :  { %327 = vmatpush3.msra.mxu0 %v30_v13 }
  0x15   :  { %328 = vmatprep.subr.mxu0 %v360_v0 }
  0x16   :  { %329 = vmatpush3.msra.mxu0 %v29_v14 }
  0x17   :  { %330 = vmatprep.subr.mxu0 %v360_v0 }
  0x18   :  { %331 = vmatpush3.msra.mxu0 %v28_v15 }
  0x19   :  { %332 = vmatprep.subr.mxu0 %v360_v0 }
  0x1a   :  { %333 = vmatpush3.msra.mxu0 %v27_v16 }
  0x1b   :  { %334 = vmatprep.subr.mxu0 %v360_v0 }
  0x1c   :  { %335 = vmatpush3.msra.mxu0 %v26_v17 }
  0x1d   :  { %336 = vmatprep.subr.mxu0 %v360_v0 }
  0x1e   :  { %337 = vmatpush3.msra.mxu0 %v25_v18 }
  0x1f   :  { %338 = vmatprep.subr.mxu0 %v360_v0 }
  0x20   :  { %339 = vmatpush3.msra.mxu0 %v24_v19 }
  0x21   :  { %341 = vmatmul.mubr.f32.vlgmr.msra.gmra.mxu0 %v23_v20 }
  0x81   :  { %v44_v21 = vpop.permute.xlu0 %43 }
  0x85   :  { %v270_v37 = vpop.permute.xlu0 %269 }
  0x86   :  { %v277_v38 = vpop.permute.xlu1 %276 }
  0xe1   :  { %v112_v22 = vpop.f32.mrf.mxu0 }
  0xe2   :  { %v113_v23 = vadd.f32 %v112_v22, %v44_v21 }
  0xe3   :  { %v342_v24 = vpop.f32.mrf.mxu0 }
  0xe4   :  { %v116_v25 = vmax.f32 %v113_v23, 0.0 }
  0xe6   :  { %344 = vmatpush3.msra.mxu1 %v116_v25 }
  0xe7   :  { %346 = vmatmul.mubr.msk.f32.vlgmr.msra.gmra.mxu1 %vm118_vm1, %v117_v26  ;;  %348 = vmatprep.subr.mxu1 %v360_v0 }
  0xe8   :  { %350 = vmatprep.mubr.msk.f32.mxu1 %vm361_vm0, %v360_v0 }
 0x1a7   :  { %v188_v28 = vpop.f32.mrf.mxu1 }
 0x1a8   :  { %v192_v29 = vsub.f32 %v116_v25, %v188_v28 }
 0x1a9   :  { %v347_v30 = vpop.f32.mrf.mxu1 }
 0x1aa   :  { %v193_v31 = vmul.f32 %v192_v29, %v192_v29 }
 0x1ac   :  { %349 = vmatpush3.msra.mxu1 %v193_v31 }
 0x1ad   :  { %351 = vmatmul.mubr.msk.f32.vlgmr.msra.gmra.mxu1 %vm118_vm1, %v117_v26 }
 0x26d   :  { %v260_v32 = vpop.f32.mrf.mxu1 }
 0x26e   :  { %v261_v33 = vadd.f32 1e-05, %v260_v32 }
 0x26f   :  { %v352_v34 = vpop.f32.mrf.mxu1 }
 0x270   :  { %358 = vrsqrt.f32 %v261_v33 }
 0x27d   :  { %v359_v35 = vpop.eup %358 }
 0x27e   :  { %v265_v36 = vmul.f32 %v359_v35, %v192_v29 }
 0x280   :  { %v272_v39 = vmul.f32 %v270_v37, %v265_v36 }
 0x282   :  { %v279_v40 = vadd.f32 %v277_v38, %v272_v39 }
 0x284   :  { %280 = vst [vmem:[%s494_s6] sm:$0xff] %v279_v40 }

// kernel: ae_forward.24
= control target key start
LH: loop header
LB: loop body
LE: loop exit
PB: predicated region body
PF: predicated region fallthrough
CT: control target
= control target key end

     0   :  { %v146_v0 = vmov 0.0   ;;  %vm147_vm0 = vmmov 0   ;;  %v148_v3 = vmov 0   ;;  %vm30_vm1 = vcmask 588800   ;;  %s205_s2 = inlined_call_operand.vmem [shape: f32[72,128], index: 2, kind: input, shape index: {}]   ;;  %s206_s1 = inlined_call_operand.vmem [shape: f32[8,1], index: 1, kind: input, shape index: {}]   ;;  %s207_s0 = inlined_call_operand.vmem [shape: f32[8,72], index: 0, kind: input, shape index: {}]   ;;  %s208_s3 = inlined_call_operand.vmem [shape: f32[8,128], index: 3, kind: output, shape index: {}]  }
   0x1   :  { %121 = vmatprep.subr.mxu0 %v146_v0  ;;  %v23_v1 = vld [vmem:[%s205_s2 + $0x40] sm:$0xff]  ;;  %v22_v2 = vld [vmem:[%s205_s2 + $0x38] sm:$0xff]  ;;  %139 = vmatprep.mubr.msk.f32.mxu0 %vm147_vm0, %v146_v0  ;;  %v21_v4 = vld [vmem:[%s205_s2 + $0x30] sm:$0xff] }
   0x2   :  { %122 = vmatpush3.msra.mxu0 %v23_v1  ;;  %145 = vset.pattern.permute.xlu0 %v148_v3  ;;  %v24_v5 = vld [vmem:[%s206_s1] sm:$0xff]  ;;  %v20_v6 = vld [vmem:[%s205_s2 + $0x28] sm:$0xff]  ;;  %v18_v8 = vld [vmem:[%s205_s2 + $0x18] sm:$0xff] }
   0x3   :  { %123 = vmatprep.subr.mxu0 %v146_v0  ;;  %27 = vperm.xlu0 %145, %v24_v5   ;;  %v19_v7 = vld [vmem:[%s205_s2 + $0x20] sm:$0xff]  ;;  %v17_v9 = vld [vmem:[%s205_s2 + $0x10] sm:$0xff]  ;;  %v16_v10 = vld [vmem:[%s205_s2 + $0x8] sm:$0xff] }
   0x4   :  { %124 = vmatpush3.msra.mxu0 %v22_v2  ;;  %v15_v11 = vld [vmem:[%s205_s2] sm:$0xff] }
   0x5   :  { %125 = vmatprep.subr.mxu0 %v146_v0  ;;  %v14_v12 = vld [vmem:[%s207_s0] sm:$0xff] }
   0x6   :  { %126 = vmatpush3.msra.mxu0 %v21_v4 }
   0x7   :  { %127 = vmatprep.subr.mxu0 %v146_v0 }
   0x8   :  { %128 = vmatpush3.msra.mxu0 %v20_v6 }
   0x9   :  { %129 = vmatprep.subr.mxu0 %v146_v0 }
   0xa   :  { %130 = vmatpush3.msra.mxu0 %v19_v7 }
   0xb   :  { %131 = vmatprep.subr.mxu0 %v146_v0 }
   0xc   :  { %132 = vmatpush3.msra.mxu0 %v18_v8 }
   0xd   :  { %133 = vmatprep.subr.mxu0 %v146_v0 }
   0xe   :  { %134 = vmatpush3.msra.mxu0 %v17_v9 }
   0xf   :  { %135 = vmatprep.subr.mxu0 %v146_v0 }
  0x10   :  { %136 = vmatpush3.msra.mxu0 %v16_v10 }
  0x11   :  { %137 = vmatprep.subr.mxu0 %v146_v0 }
  0x12   :  { %138 = vmatpush3.msra.mxu0 %v15_v11 }
  0x13   :  { %140 = vmatmul.mubr.msk.f32.vlgmr.msra.gmra.mxu0 %vm30_vm1, %v14_v12 }
  0x7e   :  { %v28_v13 = vpop.permute.xlu0 %27 }
  0xd3   :  { %v100_v14 = vpop.f32.mrf.mxu0 }
  0xd4   :  { %v101_v15 = vadd.f32 %v100_v14, %v28_v13 }
  0xd5   :  { %v141_v16 = vpop.f32.mrf.mxu0 }
  0xd6   :  { %v104_v17 = vmax.f32 %v101_v15, 0.0 }
  0xd8   :  { %105 = vst [vmem:[%s208_s3] sm:$0xff] %v104_v17 }

// kernel: ae_forward.26
= control target key start
LH: loop header
LB: loop body
LE: loop exit
PB: predicated region body
PF: predicated region fallthrough
CT: control target
= control target key end

     0   :  { %v331_v0 = vmov 0.0   ;;  %vm332_vm0 = vmmov 0   ;;  %v333_v3 = vmov 0   ;;  %vm42_vm1 = vcmask 588800   ;;  %s425_s5 = inlined_call_operand.vmem [shape: f32[72,128], index: 5, kind: input, shape index: {}]   ;;  %s426_s1 = inlined_call_operand.vmem [shape: f32[8,1], index: 1, kind: input, shape index: {}]   ;;  %s427_s4 = inlined_call_operand.vmem [shape: f32[8,1], index: 4, kind: input, shape index: {}]   ;;  %s428_s0 = inlined_call_operand.vmem [shape: f32[8,72], index: 0, kind: input, shape index: {}]   ;;  %s429_s6 = inlined_call_operand.vmem [shape: f32[8,128], index: 6, kind: input, shape index: {}]   ;;  %s430_s3 = inlined_call_operand.vmem [shape: f32[8,8], index: 3, kind: input, shape index: {}]   ;;  %s431_s2 = inlined_call_operand.vmem [shape: f32[8,8], index: 2, kind: input, shape index: {}]   ;;  %s432_s7 = inlined_call_operand.vmem [shape: f32[8,128], index: 7, kind: output, shape index: {}]  }
   0x1   :  { %296 = vmatprep.subr.mxu0 %v331_v0  ;;  %v35_v1 = vld [vmem:[%s425_s5 + $0x40] sm:$0xff]  ;;  %v34_v2 = vld [vmem:[%s425_s5 + $0x38] sm:$0xff]  ;;  %314 = vmatprep.mubr.msk.f32.mxu0 %vm332_vm0, %v331_v0  ;;  %v33_v4 = vld [vmem:[%s425_s5 + $0x30] sm:$0xff]  ;;  %vm120_vm2 = vcmask 64512  }
   0x2   :  { %297 = vmatpush3.msra.mxu0 %v35_v1  ;;  %330 = vset.pattern.permute.xlu0 %v333_v3  ;;  %v36_v5 = vld [vmem:[%s426_s1] sm:$0xff]  ;;  %v32_v6 = vld [vmem:[%s425_s5 + $0x28] sm:$0xff]  ;;  %v30_v9 = vld [vmem:[%s425_s5 + $0x18] sm:$0xff] }
   0x3   :  { %298 = vmatprep.subr.mxu0 %v331_v0  ;;  %317 = vmatprep.subr.mxu1 %v331_v0  ;;  %v267_v7 = vld [vmem:[%s427_s4] sm:$0xff]  ;;  %v29_v10 = vld [vmem:[%s425_s5 + $0x10] sm:$0xff]  ;;  %v28_v11 = vld [vmem:[%s425_s5 + $0x8] sm:$0xff] }
   0x4   :  { %299 = vmatpush3.msra.mxu0 %v34_v2  ;;  %319 = vmatprep.mubr.msk.f32.mxu1 %vm332_vm0, %v331_v0  ;;  %v31_v8 = vld [vmem:[%s425_s5 + $0x20] sm:$0xff] }
   0x5   :  { %300 = vmatprep.subr.mxu0 %v331_v0  ;;  %39 = vperm.xlu0 %330, %v36_v5   ;;  %v27_v12 = vld [vmem:[%s425_s5] sm:$0xff] }
   0x6   :  { %301 = vmatpush3.msra.mxu0 %v33_v4  ;;  %v26_v13 = vld [vmem:[%s428_s0] sm:$0xff] }
   0x7   :  { %302 = vmatprep.subr.mxu0 %v331_v0  ;;  %v119_v14 = vld [vmem:[%s429_s6] sm:$0xff] }
   0x8   :  { %303 = vmatpush3.msra.mxu0 %v32_v6  ;;  %318 = vmatpush3.msra.mxu1 %v119_v14  ;;  %v118_v15 = vld [vmem:[%s430_s3] sm:$0xff] }
   0x9   :  { %304 = vmatprep.subr.mxu0 %v331_v0  ;;  %270 = vperm.xlu0 %330, %v267_v7   ;;  %v117_v21 = vld [vmem:[%s431_s2] sm:$0xff] }
   0xa   :  { %305 = vmatpush3.msra.mxu0 %v31_v8  ;;  %320 = vmatmul.mubr.msk.f32.vlgmr.msra.gmra.mxu1 %vm120_vm2, %v118_v15 }
   0xb   :  { %306 = vmatprep.subr.mxu0 %v331_v0  ;;  %322 = vmatprep.subr.mxu1 %v331_v0 }
   0xc   :  { %307 = vmatpush3.msra.mxu0 %v30_v9  ;;  %324 = vmatprep.mubr.msk.f32.mxu1 %vm332_vm0, %v331_v0 }
   0xd   :  { %308 = vmatprep.subr.mxu0 %v331_v0 }
   0xe   :  { %309 = vmatpush3.msra.mxu0 %v29_v10 }
   0xf   :  { %310 = vmatprep.subr.mxu0 %v331_v0 }
  0x10   :  { %311 = vmatpush3.msra.mxu0 %v28_v11 }
  0x11   :  { %312 = vmatprep.subr.mxu0 %v331_v0 }
  0x12   :  { %313 = vmatpush3.msra.mxu0 %v27_v12 }
  0x13   :  { %315 = vmatmul.mubr.msk.f32.vlgmr.msra.gmra.mxu0 %vm42_vm1, %v26_v13 }
  0x80   :  { %v40_v16 = vpop.permute.xlu0 %39 }
  0x84   :  { %v271_v26 = vpop.permute.xlu0 %270 }
  0xca   :  { %v190_v22 = vpop.f32.mrf.mxu1 }
  0xcc   :  { %v321_v23 = vpop.f32.mrf.mxu1 }
  0xd3   :  { %v112_v17 = vpop.f32.mrf.mxu0 }
  0xd4   :  { %v113_v18 = vadd.f32 %v112_v17, %v40_v16 }
  0xd5   :  { %v316_v19 = vpop.f32.mrf.mxu0 }
  0xd6   :  { %v116_v20 = vmax.f32 %v113_v18, 0.0 }
  0xd8   :  { %323 = vmatpush3.msra.mxu1 %v116_v20 }
  0xd9   :  { %325 = vmatmul.mubr.msk.f32.vlgmr.msra.gmra.mxu1 %vm120_vm2, %v117_v21 }
 0x199   :  { %v263_v24 = vpop.f32.mrf.mxu1 }
 0x19a   :  { %v264_v25 = vadd.f32 %v263_v24, %v190_v22 }
 0x19b   :  { %v326_v27 = vpop.f32.mrf.mxu1 }
 0x19c   :  { %v273_v28 = vadd.f32 %v271_v26, %v264_v25 }
 0x19e   :  { %274 = vst [vmem:[%s432_s7] sm:$0xff] %v273_v28 }

// kernel: tile.35
= control target key start
LH: loop header
LB: loop body
LE: loop exit
PB: predicated region body
PF: predicated region fallthrough
CT: control target
= control target key end

     0   :  { %s22_s0 = inlined_call_operand.vmem [shape: f32[8], index: 0, kind: input, shape index: {}]   ;;  %s23_s1 = inlined_call_operand.vmem [shape: f32[4,8], index: 1, kind: output, shape index: {}]  }
   0x1   :  { %v4_v0 = vld [vmem:[%s22_s0] ss:$0 sm:$0xff] }
   0x2   :  { %5 = vst [vmem:[%s23_s1] sm:$0xf] %v4_v0 }

// kernel: tile.2
= control target key start
LH: loop header
LB: loop body
LE: loop exit
PB: predicated region body
PF: predicated region fallthrough
CT: control target
= control target key end

     0   :  { %s67_s8 = smov 125   ;;  %vm8_vm0 = vcmask 7168   ;;  %s68_s11 = smov 126   ;;  %s118_s0 = inlined_call_operand.vmem [shape: f32[4,8], index: 0, kind: input, shape index: {}]   ;;  %s119_s1 = inlined_call_operand.vmem [shape: f32[32,1], index: 1, kind: output, shape index: {}]  }
   0x1   :  { %v5_v0 = vld [vmem:[%s118_s0] sm:$0xf]  ;;  %s66_s0 = smov 127   ;;  %s69_s12 = smov 124  }
   0x2   :  { %6 = vst [vmem:[#allocation0] sm:$0xf] %v5_v0  ;;  %s70_s13 = smov 123   ;;  %s71_s14 = smov 122  }
   0x3   :  { %s72_s15 = smov 121  }
   0x9   :  { %v10_v1 = vld [vmem:[#allocation0] sm:$0xf]  }
   0xa   :  { %v22_v2 = vld [vmem:[#allocation0] sm:$0xf]   ;;  %11 = vrot.lane.b32.xlu0 %v10_v1, %s66_s0 }
   0xb   :  { %23 = vrot.lane.b32.xlu1 %v22_v2, %s67_s8  ;;  %v16_v3 = vld [vmem:[#allocation0] sm:$0xf]  }
   0xc   :  { %v28_v4 = vld [vmem:[#allocation0] sm:$0xf]  }
   0xd   :  { %v7_v5 = vld [vmem:[#allocation0] sm:$0xf]  }
   0xe   :  { %9 = vst.msk [vmem:[%s119_s1] ss:$8 sm:$0xf] %vm8_vm0, %v7_v5   ;;  %17 = vrot.lane.b32.xlu0 %v16_v3, %s68_s11  ;;  %v34_v6 = vld [vmem:[#allocation0] sm:$0xf]  }
   0xf   :  { %29 = vrot.lane.b32.xlu1 %v28_v4, %s69_s12  ;;  %v40_v7 = vld [vmem:[#allocation0] sm:$0xf]  }
  0x10   :  { %v46_v8 = vld [vmem:[#allocation0] sm:$0xf]  }
  0x12   :  { %35 = vrot.lane.b32.xlu0 %v34_v6, %s70_s13 }
  0x13   :  { %41 = vrot.lane.b32.xlu1 %v40_v7, %s71_s14 }
  0x16   :  { %47 = vrot.lane.b32.xlu0 %v46_v8, %s72_s15 }
  0x7c   :  { %v12_v9 = vpop.permute.xlu0 %11  }
  0x7d   :  { %v24_v10 = vpop.permute.xlu1 %23   ;;  %52 = vst.msk [vmem:[%s119_s1 + $0x1] ss:$8 sm:$0xf] %vm8_vm0, %v12_v9  }
  0x7e   :  { %54 = vst.msk [vmem:[%s119_s1 + $0x3] ss:$8 sm:$0xf] %vm8_vm0, %v24_v10  }
  0x80   :  { %v18_v11 = vpop.permute.xlu0 %17  }
  0x81   :  { %v30_v12 = vpop.permute.xlu1 %29   ;;  %53 = vst.msk [vmem:[%s119_s1 + $0x2] ss:$8 sm:$0xf] %vm8_vm0, %v18_v11  }
  0x82   :  { %55 = vst.msk [vmem:[%s119_s1 + $0x4] ss:$8 sm:$0xf] %vm8_vm0, %v30_v12  }
  0x84   :  { %v36_v13 = vpop.permute.xlu0 %35  }
  0x85   :  { %v42_v14 = vpop.permute.xlu1 %41   ;;  %56 = vst.msk [vmem:[%s119_s1 + $0x5] ss:$8 sm:$0xf] %vm8_vm0, %v36_v13  }
  0x86   :  { %57 = vst.msk [vmem:[%s119_s1 + $0x6] ss:$8 sm:$0xf] %vm8_vm0, %v42_v14  }
  0x88   :  { %v48_v15 = vpop.permute.xlu0 %47  }
  0x89   :  { %58 = vst.msk [vmem:[%s119_s1 + $0x7] ss:$8 sm:$0xf] %vm8_vm0, %v48_v15  }

// kernel: ae_forward.31
= control target key start
LH: loop header
LB: loop body
LE: loop exit
PB: predicated region body
PF: predicated region fallthrough
CT: control target
= control target key end

     0   :  { %v533_v2 = vmov 0   ;;  %vm60_vm0 = vcmask 588800   ;;  %vm166_vm1 = vcmask 261120   ;;  %s680_s5 = inlined_call_operand.vmem [shape: f32[72,128], index: 5, kind: input, shape index: {}]   ;;  %s681_s0 = inlined_call_operand.vmem [shape: f32[32,72], index: 0, kind: input, shape index: {}]   ;;  %s682_s1 = inlined_call_operand.vmem [shape: f32[32,1], index: 1, kind: input, shape index: {}]   ;;  %s683_s2 = inlined_call_operand.vmem [shape: f32[32,1], index: 2, kind: input, shape index: {}]   ;;  %s684_s3 = inlined_call_operand.vmem [shape: f32[32,1], index: 3, kind: input, shape index: {}]   ;;  %s685_s4 = inlined_call_operand.vmem [shape: f32[32,32], index: 4, kind: input, shape index: {}]   ;;  %s686_s6 = inlined_call_operand.vmem [shape: f32[32,128], index: 6, kind: output, shape index: {}]  }
   0x1   :  { %v35_v0 = vld [vmem:[%s680_s5 + $0x40] sm:$0xff]  ;;  %v34_v1 = vld [vmem:[%s680_s5 + $0x38] sm:$0xff]  ;;  %523 = vset.pattern.permute.xlu0 %v533_v2  ;;  %524 = vset.pattern.permute.xlu1 %v533_v2  ;;  %v33_v3 = vld [vmem:[%s680_s5 + $0x30] sm:$0xff] }
   0x2   :  { %470 = vmatprep.subr.mxu0 %v35_v0  ;;  %v23_v4 = vld [vmem:[%s681_s0] sm:$0xff]  ;;  %v32_v5 = vld [vmem:[%s680_s5 + $0x28] sm:$0xff]  ;;  %v39_v6 = vld [vmem:[%s682_s1 + $0x18] sm:$0xff] }
   0x3   :  { %471 = vmatpush3.msra.mxu0 %v35_v0  ;;  %488 = vmatprep.mubr.msk.f32.mxu0 %vm60_vm0, %v23_v4  ;;  %v37_v7 = vld [vmem:[%s682_s1 + $0x8] sm:$0xff]  ;;  %v31_v8 = vld [vmem:[%s680_s5 + $0x20] sm:$0xff]  ;;  %v38_v9 = vld [vmem:[%s682_s1 + $0x10] sm:$0xff] }
   0x4   :  { %472 = vmatprep.subr.mxu0 %v34_v1  ;;  %57 = vperm.xlu0 %523, %v39_v6   ;;  %v36_v10 = vld [vmem:[%s682_s1] sm:$0xff]  ;;  %v30_v11 = vld [vmem:[%s680_s5 + $0x18] sm:$0xff]  ;;  %v29_v12 = vld [vmem:[%s680_s5 + $0x10] sm:$0xff] }
   0x5   :  { %473 = vmatpush3.msra.mxu0 %v34_v1  ;;  %47 = vperm.xlu1 %524, %v37_v7   ;;  %v365_v13 = vld [vmem:[%s683_s2] sm:$0xff]  ;;  %v366_v14 = vld [vmem:[%s683_s2 + $0x8] sm:$0xff]  ;;  %v367_v17 = vld [vmem:[%s683_s2 + $0x10] sm:$0xff] }
   0x6   :  { %474 = vmatprep.subr.mxu0 %v33_v3  ;;  %v28_v15 = vld [vmem:[%s680_s5 + $0x8] sm:$0xff]  ;;  %v27_v16 = vld [vmem:[%s680_s5] sm:$0xff]  ;;  %v368_v18 = vld [vmem:[%s683_s2 + $0x18] sm:$0xff] }
   0x7   :  { %475 = vmatpush3.msra.mxu0 %v33_v3  ;;  %v24_v19 = vld [vmem:[%s681_s0 + $0x8] sm:$0xff]  ;;  %v25_v20 = vld [vmem:[%s681_s0 + $0x10] sm:$0xff]  ;;  %v393_v21 = vld [vmem:[%s684_s3] sm:$0xff] }
   0x8   :  { %476 = vmatprep.subr.mxu0 %v32_v5  ;;  %52 = vperm.xlu0 %523, %v38_v9   ;;  %v394_v22 = vld [vmem:[%s684_s3 + $0x8] sm:$0xff]  ;;  %v26_v23 = vld [vmem:[%s681_s0 + $0x18] sm:$0xff]  ;;  %v395_v24 = vld [vmem:[%s684_s3 + $0x10] sm:$0xff] }
   0x9   :  { %477 = vmatpush3.msra.mxu0 %v32_v5  ;;  %42 = vperm.xlu1 %524, %v36_v10   ;;  %v396_v25 = vld [vmem:[%s684_s3 + $0x18] sm:$0xff]  ;;  %v162_v26 = vld [vmem:[%s685_s4] sm:$0xff]  ;;  %v163_v43 = vld [vmem:[%s685_s4 + $0x8] sm:$0xff] }
   0xa   :  { %478 = vmatprep.subr.mxu0 %v31_v8  ;;  %502 = vmatprep.mubr.msk.f32.mxu1 %vm166_vm1, %v162_v26  ;;  %v164_v44 = vld [vmem:[%s685_s4 + $0x10] sm:$0xff]  ;;  %v165_v45 = vld [vmem:[%s685_s4 + $0x18] sm:$0xff] }
   0xb   :  { %479 = vmatpush3.msra.mxu0 %v31_v8 }
   0xc   :  { %480 = vmatprep.subr.mxu0 %v30_v11  ;;  %371 = vperm.xlu0 %523, %v365_v13  }
   0xd   :  { %481 = vmatpush3.msra.mxu0 %v30_v11  ;;  %376 = vperm.xlu1 %524, %v366_v14  }
   0xe   :  { %482 = vmatprep.subr.mxu0 %v29_v12 }
   0xf   :  { %483 = vmatpush3.msra.mxu0 %v29_v12 }
  0x10   :  { %484 = vmatprep.subr.mxu0 %v28_v15  ;;  %381 = vperm.xlu0 %523, %v367_v17  }
  0x11   :  { %485 = vmatpush3.msra.mxu0 %v28_v15  ;;  %386 = vperm.xlu1 %524, %v368_v18  }
  0x12   :  { %486 = vmatprep.subr.mxu0 %v27_v16 }
  0x13   :  { %487 = vmatpush3.msra.mxu0 %v27_v16 }
  0x14   :  { %489 = vmatmul.mubr.msk.f32.vlgmr.msra.gmra.mxu0 %vm60_vm0, %v24_v19  ;;  %399 = vperm.xlu0 %523, %v393_v21  }
  0x15   :  { %491 = vmatprep.mubr.msk.f32.mxu0 %vm60_vm0, %v25_v20  ;;  %404 = vperm.xlu1 %524, %v394_v22  }
  0x18   :  { %492 = vmatmul.mubr.msk.f32.gmra.mxu0 %vm60_vm0, %v26_v23  ;;  %409 = vperm.xlu0 %523, %v395_v24  }
  0x19   :  { %414 = vperm.xlu1 %524, %v396_v25  }
  0x7f   :  { %v58_v27 = vpop.permute.xlu0 %57 }
  0x80   :  { %v48_v29 = vpop.permute.xlu1 %47 }
  0x83   :  { %v53_v33 = vpop.permute.xlu0 %52 }
  0x84   :  { %v43_v38 = vpop.permute.xlu1 %42 }
  0x87   :  { %v372_v3 = vpop.permute.xlu0 %371 }
  0x88   :  { %v377_v0 = vpop.permute.xlu1 %376 }
  0x8b   :  { %v382_v5 = vpop.permute.xlu0 %381 }
  0x8c   :  { %v387_v4 = vpop.permute.xlu1 %386 }
  0x8f   :  { %v400_v13 = vpop.permute.xlu0 %399 }
  0x90   :  { %v405_v9 = vpop.permute.xlu1 %404 }
  0x93   :  { %v410_v24 = vpop.permute.xlu0 %409 }
  0x94   :  { %v415_v21 = vpop.permute.xlu1 %414 }
  0xd4   :  { %v490_v28 = vpop.f32.mrf.mxu0 }
  0xd5   :  { %v145_v35 = vadd.f32 %v490_v28, %v48_v29 }
  0xd6   :  { %v139_v30 = vpop.f32.mrf.mxu0 }
  0xd7   :  { %v140_v39 = vadd.f32 %v139_v30, %v43_v38  ;;  %v159_v41 = vmax.f32 %v145_v35, 0.0 }
  0xd8   :  { %v493_v31 = vpop.f32.mrf.mxu0 }
  0xd9   :  { %v155_v32 = vadd.f32 %v493_v31, %v58_v27  ;;  %v158_v42 = vmax.f32 %v140_v39, 0.0 }
  0xda   :  { %v149_v34 = vpop.f32.mrf.mxu0 }
  0xdb   :  { %v161_v36 = vmax.f32 %v155_v32, 0.0  ;;  %v150_v37 = vadd.f32 %v149_v34, %v53_v33 }
  0xdd   :  { %v160_v40 = vmax.f32 %v150_v37, 0.0  ;;  %494 = vmatprep.subr.mxu1 %v161_v36 }
  0xde   :  { %495 = vmatpush3.msra.mxu1 %v161_v36 }
  0xdf   :  { %496 = vmatprep.subr.mxu1 %v160_v40 }
  0xe0   :  { %497 = vmatpush3.msra.mxu1 %v160_v40 }
  0xe1   :  { %498 = vmatprep.subr.mxu1 %v159_v41 }
  0xe2   :  { %499 = vmatpush3.msra.mxu1 %v159_v41 }
  0xe3   :  { %500 = vmatprep.subr.mxu1 %v158_v42 }
  0xe4   :  { %501 = vmatpush3.msra.mxu1 %v158_v42 }
  0xe5   :  { %503 = vmatmul.mubr.msk.f32.vlgmr.msra.gmra.mxu1 %vm166_vm1, %v163_v43 }
  0xe6   :  { %505 = vmatprep.mubr.msk.f32.mxu1 %vm166_vm1, %v164_v44 }
  0xe9   :  { %506 = vmatmul.mubr.msk.f32.gmra.mxu1 %vm166_vm1, %v165_v45 }
  0xea   :  { %516 = vmatprep.mubr.msk.f32.mxu1 %vm166_vm1, %v162_v26 }
 0x1a5   :  { %v504_v46 = vpop.f32.mrf.mxu1 }
 0x1a6   :  { %v265_v51 = vsub.f32 %v159_v41, %v504_v46 }
 0x1a7   :  { %v245_v47 = vpop.f32.mrf.mxu1 }
 0x1a8   :  { %v264_v54 = vsub.f32 %v158_v42, %v245_v47  ;;  %v269_v56 = vmul.f32 %v265_v51, %v265_v51 }
 0x1a9   :  { %v507_v48 = vpop.f32.mrf.mxu1 }
 0x1aa   :  { %v267_v49 = vsub.f32 %v161_v36, %v507_v48  ;;  %v268_v57 = vmul.f32 %v264_v54, %v264_v54 }
 0x1ab   :  { %v255_v50 = vpop.f32.mrf.mxu1 }
 0x1ac   :  { %v271_v52 = vmul.f32 %v267_v49, %v267_v49  ;;  %v266_v53 = vsub.f32 %v160_v40, %v255_v50 }
 0x1ae   :  { %v270_v55 = vmul.f32 %v266_v53, %v266_v53  ;;  %508 = vmatprep.subr.mxu1 %v271_v52 }
 0x1af   :  { %509 = vmatpush3.msra.mxu1 %v271_v52 }
 0x1b0   :  { %510 = vmatprep.subr.mxu1 %v270_v55 }
 0x1b1   :  { %511 = vmatpush3.msra.mxu1 %v270_v55 }
 0x1b2   :  { %512 = vmatprep.subr.mxu1 %v269_v56 }
 0x1b3   :  { %513 = vmatpush3.msra.mxu1 %v269_v56 }
 0x1b4   :  { %514 = vmatprep.subr.mxu1 %v268_v57 }
 0x1b5   :  { %515 = vmatpush3.msra.mxu1 %v268_v57 }
 0x1b6   :  { %517 = vmatmul.mubr.msk.f32.vlgmr.msra.gmra.mxu1 %vm166_vm1, %v163_v43 }
 0x1b7   :  { %519 = vmatprep.mubr.msk.f32.mxu1 %vm166_vm1, %v164_v44 }
 0x1ba   :  { %520 = vmatmul.mubr.msk.f32.gmra.mxu1 %vm166_vm1, %v165_v45 }
 0x276   :  { %v518_v58 = vpop.f32.mrf.mxu1 }
 0x277   :  { %v344_v59 = vadd.f32 1e-05, %v518_v58 }
 0x278   :  { %v338_v60 = vpop.f32.mrf.mxu1 }
 0x279   :  { %525 = vrsqrt.f32 %v344_v59  ;;  %v339_v61 = vadd.f32 1e-05, %v338_v60 }
 0x27a   :  { %v521_v62 = vpop.f32.mrf.mxu1 }
 0x27b   :  { %527 = vrsqrt.f32 %v339_v61  ;;  %v354_v63 = vadd.f32 1e-05, %v521_v62 }
 0x27c   :  { %v348_v1 = vpop.f32.mrf.mxu1 }
 0x27d   :  { %529 = vrsqrt.f32 %v354_v63  ;;  %v349_v2 = vadd.f32 1e-05, %v348_v1 }
 0x27f   :  { %531 = vrsqrt.f32 %v349_v2 }
 0x286   :  { %v526_v6 = vpop.eup %525 }
 0x287   :  { %v362_v7 = vmul.f32 %v526_v6, %v265_v51 }
 0x288   :  { %v528_v8 = vpop.eup %527 }
 0x289   :  { %v390_v10 = vmul.f32 %v377_v0, %v362_v7  ;;  %v361_v11 = vmul.f32 %v528_v8, %v264_v54 }
 0x28a   :  { %v530_v12 = vpop.eup %529 }
 0x28b   :  { %v418_v14 = vadd.f32 %v405_v9, %v390_v10  ;;  %v389_v15 = vmul.f32 %v372_v3, %v361_v11  ;;  %v364_v16 = vmul.f32 %v530_v12, %v267_v49 }
 0x28c   :  { %v532_v17 = vpop.eup %531 }
 0x28d   :  { %422 = vst [vmem:[%s686_s6 + $0x8] sm:$0xff] %v418_v14  ;;  %v417_v18 = vadd.f32 %v400_v13, %v389_v15  ;;  %v392_v19 = vmul.f32 %v387_v4, %v364_v16  ;;  %v363_v20 = vmul.f32 %v532_v17, %v266_v53 }
 0x28f   :  { %421 = vst [vmem:[%s686_s6] sm:$0xff] %v417_v18  ;;  %v420_v22 = vadd.f32 %v415_v21, %v392_v19  ;;  %v391_v23 = vmul.f32 %v382_v5, %v363_v20 }
 0x291   :  { %424 = vst [vmem:[%s686_s6 + $0x18] sm:$0xff] %v420_v22  ;;  %v419_v25 = vadd.f32 %v410_v24, %v391_v23 }
 0x293   :  { %423 = vst [vmem:[%s686_s6 + $0x10] sm:$0xff] %v419_v25 }

// kernel: ae_forward.37
= control target key start
LH: loop header
LB: loop body
LE: loop exit
PB: predicated region body
PF: predicated region fallthrough
CT: control target
= control target key end

     0   :  { %s929_s27 = smov 0   ;;  %s931_s28 = smov 0   ;;  %s1055_s0 = inlined_call_operand.vmem [shape: f32[4,72], index: 0, kind: input, shape index: {}]   ;;  %s1056_s1 = inlined_call_operand.vmem [shape: f32[4,1], index: 1, kind: input, shape index: {}]   ;;  %s1057_s2 = inlined_call_operand.vmem [shape: f32[4,1], index: 2, kind: input, shape index: {}]   ;;  %s1058_s3 = inlined_call_operand.vmem [shape: f32[4,1], index: 3, kind: input, shape index: {}]   ;;  %s1059_s4 = inlined_call_operand.vmem [shape: f32[4,4], index: 4, kind: input, shape index: {}]   ;;  %s1060_s5 = inlined_call_operand.vmem [shape: f32[3,4], index: 5, kind: input, shape index: {}]   ;;  %s1061_s6 = inlined_call_operand.vmem [shape: f32[3,1], index: 6, kind: input, shape index: {}]   ;;  %s1062_s7 = inlined_call_operand.vmem [shape: f32[72,512], index: 7, kind: input, shape index: {}]   ;;  %s1063_s8 = inlined_call_operand.vmem [shape: f32[3,512], index: 8, kind: output, shape index: {}]  }
   0x1   :  { %s933_s29 = smov 0  }
   0x2 LB: > { %s802_s30 = sadd.s32 4294967295, %s880_s29   ;;  %s946_s9 = sadd.s32 1, %s880_s29   ;;  %s880_s29 = sphi %s933_s29, %s1066_s29   ;;  %s876_s28 = sphi %s931_s28, %s1065_s28   ;;  %s872_s27 = sphi %s929_s27, %s1064_s27  }
   0x3   : > { %s169_s10 = ssub.s32 %s880_s29, %s946_s9  ;;  %s172_s11 = sadd.s32 1, %s876_s28 }
   0x4   : > { %p170_p0 = scmp.eq.s32.totalorder %s169_s10, 0  ;;  %p179_p1 = scmp.ne.s32.totalorder %s876_s28, %s872_s27 }
   0x5   : > { %p180_p2 = scmp.eq.s32.totalorder %s880_s29, 0  ;;  %p805_p4 = scmp.ge.s32.totalorder %s880_s29, 2 }
   0x6   : > { %s955_s12 = scalar_select %p170_p0, %s876_s28, %s172_s11  }
   0x7   : > { %p181_p3 = por %p180_p2, %p179_p1  ;;  %252 = sbr.rel (%p805_p4) target bundleno = 25 (0x19), region = 44 }
   0xc   : > { %255 = sbr.rel (!%p181_p3) target bundleno = 25 (0x19), region = 48  ;;  %s257_s13 = sand.u32 (%p181_p3), 1, %s876_s28  }
   0xd   : > { %s823_s14 = sshll.u32 (%p181_p3), %s880_s29, 4  ;;  %s824_s15 = smul.u32 (%p181_p3), 144, %s257_s13 }
   0xe   : > { %s963_s18 = scalar_lea.vmem (%p181_p3), %s1062_s7, %s823_s14 }
   0xf   : > { %v275_v0 = vld [vmem:[%s963_s18] sm:$0xff] (%p181_p3)  ;;  %v277_v1 = vld [vmem:[%s963_s18 + $0x8] sm:$0xff] (%p181_p3)  ;;  %s259_s19 = scalar_lea.vmem (%p181_p3), [#allocation2], %s824_s15 }
  0x10   : > { %v279_v2 = vld [vmem:[%s963_s18 + $0x20] sm:$0xff] (%p181_p3)  ;;  %v281_v3 = vld [vmem:[%s963_s18 + $0x28] sm:$0xff] (%p181_p3)  ;;  %276 = vst [vmem:[%s259_s19] sm:$0xff] (%p181_p3), %v275_v0  ;;  %278 = vst [vmem:[%s259_s19 + $0x8] sm:$0xff] (%p181_p3), %v277_v1 }
  0x11   : > { %v283_v4 = vld [vmem:[%s963_s18 + $0x40] sm:$0xff]  ;;  %v285_v5 = vld [vmem:[%s963_s18 + $0x48] sm:$0xff]  ;;  %280 = vst [vmem:[%s259_s19 + $0x10] sm:$0xff] %v279_v2  ;;  %282 = vst [vmem:[%s259_s19 + $0x18] sm:$0xff] %v281_v3 }
  0x12   : > { %284 = vst [vmem:[%s259_s19 + $0x20] sm:$0xff] %v283_v4  ;;  %286 = vst [vmem:[%s259_s19 + $0x28] sm:$0xff] %v285_v5  ;;  %v287_v6 = vld [vmem:[%s963_s18 + $0x60] sm:$0xff]  ;;  %v289_v7 = vld [vmem:[%s963_s18 + $0x68] sm:$0xff] }
  0x13   : > { %v291_v8 = vld [vmem:[%s963_s18 + $0x80] sm:$0xff]  ;;  %288 = vst [vmem:[%s259_s19 + $0x30] sm:$0xff] %v287_v6  ;;  %290 = vst [vmem:[%s259_s19 + $0x38] sm:$0xff] %v289_v7  ;;  %v293_v9 = vld [vmem:[%s963_s18 + $0x88] sm:$0xff] }
  0x14   : > { %292 = vst [vmem:[%s259_s19 + $0x40] sm:$0xff] %v291_v8  ;;  %v295_v10 = vld [vmem:[%s963_s18 + $0xa0] sm:$0xff]  ;;  %v297_v11 = vld [vmem:[%s963_s18 + $0xa8] sm:$0xff]  ;;  %294 = vst [vmem:[%s259_s19 + $0x48] sm:$0xff] %v293_v9 }
  0x15   : > { %296 = vst [vmem:[%s259_s19 + $0x50] sm:$0xff] %v295_v10  ;;  %298 = vst [vmem:[%s259_s19 + $0x58] sm:$0xff] %v297_v11  ;;  %v299_v12 = vld [vmem:[%s963_s18 + $0xc0] sm:$0xff]  ;;  %v301_v13 = vld [vmem:[%s963_s18 + $0xc8] sm:$0xff] }
  0x16   : > { %v303_v14 = vld [vmem:[%s963_s18 + $0xe0] sm:$0xff]  ;;  %300 = vst [vmem:[%s259_s19 + $0x60] sm:$0xff] %v299_v12  ;;  %302 = vst [vmem:[%s259_s19 + $0x68] sm:$0xff] %v301_v13  ;;  %v305_v15 = vld [vmem:[%s963_s18 + $0xe8] sm:$0xff] }
  0x17   : > { %304 = vst [vmem:[%s259_s19 + $0x70] sm:$0xff] %v303_v14  ;;  %v307_v16 = vld [vmem:[%s963_s18 + $0x100] sm:$0xff]  ;;  %v309_v17 = vld [vmem:[%s963_s18 + $0x108] sm:$0xff]  ;;  %306 = vst [vmem:[%s259_s19 + $0x78] sm:$0xff] %v305_v15 }
  0x18   : > { %308 = vst [vmem:[%s259_s19 + $0x80] sm:$0xff] %v307_v16  ;;  %310 = vst [vmem:[%s259_s19 + $0x88] sm:$0xff] %v309_v17 }
  0x19 PF: > { %p808_p5 = scmp.ge.s32.totalorder %s880_s29, 1  ;;  %p315_p6 = scmp.lt.s32.totalorder %s880_s29, 3 }
  0x1b   : > { %p316_p7 = pnand %p808_p5, %p315_p6 }
  0x1c   : > { %s322_s20 = sand.u32 (!%p316_p7), 1, %s872_s27  }
  0x1d   : > { %319 = sbr.rel (%p316_p7) target bundleno = 876 (0x36c), region = 71 }
  0x1e   : > { %s825_s21 = smul.u32 (!%p316_p7), 144, %s322_s20  ;;  %s809_s20 = sshll.u32 (!%p316_p7), %s802_s30, 1 }
  0x1f   : > { %p357_p8 = scmp.lt.s32.totalorder (!%p316_p7), %s809_s20, 3 }
  0x20   : > { %s994_s26 = scalar_lea.vmem (!%p316_p7), [#allocation2], %s825_s21 }
  0x22   : > { %v882_v18 = vmov 0.0   ;;  %v883_v19 = vmov 0   ;;  %v381_v20 = vld [vmem:[%s1056_s1] sm:$0xf]  ;;  %v380_v22 = vld [vmem:[%s994_s26 + $0x88] sm:$0xff]  ;;  %v378_v24 = vld [vmem:[%s994_s26 + $0x78] sm:$0xff] }
  0x23   : > { %455 = vmatprep.mubr.f32.mxu0 %v882_v18  ;;  %852 = vset.pattern.permute.xlu0 %v883_v19  ;;  %v632_v21 = vld [vmem:[%s1057_s2] sm:$0xf]  ;;  %v376_v26 = vld [vmem:[%s994_s26 + $0x68] sm:$0xff]  ;;  %v374_v28 = vld [vmem:[%s994_s26 + $0x58] sm:$0xff]  ;;  %vm387_vm0 = vcmask 588800   ;;  %vm469_vm1 = vcmask 1043456  }
  0x24   : > { %384 = vperm.xlu0 %852, %v381_v20   ;;  %540 = vmatprep.mubr.f32.mxu1 %v882_v18  ;;  %v379_v23 = vld [vmem:[%s994_s26 + $0x80] sm:$0xff]  ;;  %v377_v25 = vld [vmem:[%s994_s26 + $0x70] sm:$0xff]  ;;  %v372_v30 = vld [vmem:[%s994_s26 + $0x48] sm:$0xff]  ;;  %vm465_vm2 = vcmask 31744   ;;  %s1068_s20 = smov (!%p357_p8, %s809_s20), 3 }
  0x25   : > { %853 = vset.pattern.permute.xlu1 %v883_v19  ;;  %405 = vmatprep.subr.mxu0 %v380_v22  ;;  %v375_v27 = vld [vmem:[%s994_s26 + $0x60] sm:$0xff]  ;;  %v373_v29 = vld [vmem:[%s994_s26 + $0x50] sm:$0xff]  ;;  %v370_v32 = vld [vmem:[%s994_s26 + $0x38] sm:$0xff]  ;;  %s810_s21 = sshll.u32 %s1068_s20, 2 }
  0x26   : > { %406 = vmatpush1.msra.mxu0 %v379_v23  ;;  %v371_v31 = vld [vmem:[%s994_s26 + $0x40] sm:$0xff]  ;;  %v369_v33 = vld [vmem:[%s994_s26 + $0x30] sm:$0xff]  ;;  %v368_v34 = vld [vmem:[%s994_s26 + $0x28] sm:$0xff]  ;;  %s360_s24 = scalar_lea.vmem %s1063_s8, %s810_s21 }
  0x27   : > { %407 = vmatprep.subr.mxu0 %v378_v24  ;;  %v367_v35 = vld [vmem:[%s994_s26 + $0x20] sm:$0xff]  ;;  %v366_v36 = vld [vmem:[%s994_s26 + $0x18] sm:$0xff]  ;;  %v365_v37 = vld [vmem:[%s994_s26 + $0x10] sm:$0xff] }
  0x28   : > { %635 = vperm.xlu0 %852, %v632_v21   ;;  %408 = vmatpush1.msra.mxu0 %v377_v25  ;;  %v364_v38 = vld [vmem:[%s994_s26 + $0x8] sm:$0xff]  ;;  %v363_v39 = vld [vmem:[%s994_s26] sm:$0xff] }
  0x29   : > { %409 = vmatprep.subr.mxu0 %v376_v26  ;;  %v362_v40 = vld [vmem:[%s1055_s0] sm:$0xf] }
  0x2a   : > { %410 = vmatpush1.msra.mxu0 %v375_v27  ;;  %v464_v48 = vld [vmem:[%s1059_s4] sm:$0xf] }
  0x2b   : > { %411 = vmatprep.subr.mxu0 %v374_v28  ;;  %v640_v49 = vld [vmem:[%s1058_s3] sm:$0xf] }
  0x2c   : > { %412 = vmatpush1.msra.mxu0 %v373_v29  ;;  %643 = vperm.xlu1 %853, %v640_v49   ;;  %v649_v50 = vld [vmem:[%s1061_s6] sm:$0x7] }
  0x2d   : > { %413 = vmatprep.subr.mxu0 %v372_v30  ;;  %v648_v7 = vld [vmem:[%s1060_s5] sm:$0x7] }
  0x2e   : > { %414 = vmatpush1.msra.mxu0 %v371_v31 }
  0x2f   : > { %415 = vmatprep.subr.mxu0 %v370_v32 }
  0x30   : > { %416 = vmatpush1.msra.mxu0 %v369_v33  ;;  %652 = vperm.xlu1 %853, %v649_v50  }
  0x31   : > { %417 = vmatprep.subr.mxu0 %v368_v34 }
  0x32   : > { %418 = vmatpush1.msra.mxu0 %v367_v35 }
  0x33   : > { %419 = vmatprep.subr.mxu0 %v366_v36 }
  0x34   : > { %420 = vmatpush1.msra.mxu0 %v365_v37 }
  0x35   : > { %421 = vmatprep.subr.mxu0 %v364_v38 }
  0x36   : > { %422 = vmatpush1.msra.mxu0 %v363_v39 }
  0x37   : > { %811 = vmatmul.mubr.msk.f32.vlgmr.msra.gmra.mxu0 %vm387_vm0, %v362_v40 }
  0x9f   : > { %v385_v42 = vpop.permute.xlu0 %384 }
  0xa3   : > { %v636_v0 = vpop.permute.xlu0 %635 }
  0xa7   : > { %v644_v4 = vpop.permute.xlu1 %643 }
  0xab   : > { %v653_v9 = vpop.permute.xlu1 %652 }
  0xf7   : > { %v457_v41 = vpop.f32.mrf.mxu0 }
  0xf8   : > { %v458_v43 = vadd.f32 %v457_v41, %v385_v42 }
  0xf9   : > { %v459_v44 = vpop.f32.mrf.mxu0 }
  0xfa   : > { %v460_v45 = vadd.f32 %v459_v44, %v385_v42  ;;  %v462_v47 = vmax.f32 %v458_v43, 0.0 }
  0xfc   : > { %v463_v46 = vmax.f32 %v460_v45, 0.0 }
  0xfe   : > { %812 = vmatprep.subr.msk.mxu1 %vm469_vm1, %v463_v46 }
  0xff   : > { %813 = vmatpush1.msk.msra.mxu1 %vm469_vm1, %v462_v47 }
 0x100   : > { %814 = vmatmul.mubr.msk.f32.vlgmr.msra.gmra.mxu1 %vm465_vm2, %v464_v48 }
 0x101   : > { %621 = vmatprep.mubr.f32.mxu1 %v882_v18 }
 0x1c0   : > { %v542_v51 = vpop.f32.mrf.mxu1 }
 0x1c1   : > { %v547_v52 = vsub.f32 %v462_v47, %v542_v51 }
 0x1c2   : > { %v544_v53 = vpop.f32.mrf.mxu1 }
 0x1c3   : > { %v548_v54 = vsub.f32 %v463_v46, %v544_v53  ;;  %v549_v56 = vmul.f32 %v547_v52, %v547_v52 }
 0x1c5   : > { %v550_v55 = vmul.f32 %v548_v54, %v548_v54 }
 0x1c7   : > { %815 = vmatprep.subr.msk.mxu1 %vm469_vm1, %v550_v55 }
 0x1c8   : > { %816 = vmatpush1.msk.msra.mxu1 %vm469_vm1, %v549_v56 }
 0x1c9   : > { %817 = vmatmul.mubr.msk.f32.vlgmr.msra.gmra.mxu1 %vm465_vm2, %v464_v48 }
 0x1ca   : > { %728 = vmatprep.mubr.f32.mxu1 %v882_v18 }
 0x289   : > { %v623_v57 = vpop.f32.mrf.mxu1 }
 0x28a   : > { %v624_v58 = vadd.f32 1e-05, %v623_v57 }
 0x28b   : > { %v625_v59 = vpop.f32.mrf.mxu1 }
 0x28c   : > { %854 = vrsqrt.f32 %v624_v58  ;;  %v626_v60 = vadd.f32 1e-05, %v625_v59 }
 0x28e   : > { %856 = vrsqrt.f32 %v626_v60 }
 0x299   : > { %v855_v61 = vpop.eup %854 }
 0x29a   : > { %v630_v62 = vmul.f32 %v855_v61, %v547_v52 }
 0x29b   : > { %v857_v63 = vpop.eup %856 }
 0x29c   : > { %v631_v1 = vmul.f32 %v857_v63, %v548_v54  ;;  %v638_v2 = vmul.f32 %v636_v0, %v630_v62 }
 0x29e   : > { %v639_v3 = vmul.f32 %v636_v0, %v631_v1  ;;  %v646_v6 = vadd.f32 %v644_v4, %v638_v2 }
 0x2a0   : > { %v647_v5 = vadd.f32 %v644_v4, %v639_v3 }
 0x2a2   : > { %818 = vmatprep.subr.msk.mxu1 %vm469_vm1, %v647_v5 }
 0x2a3   : > { %819 = vmatpush1.msk.msra.mxu1 %vm469_vm1, %v646_v6 }
 0x2a4   : > { %820 = vmatmul.mubr.msk.f32.vlgmr.msra.gmra.mxu1 %vm465_vm2, %v648_v7 }
 0x364   : > { %v730_v8 = vpop.f32.mrf.mxu1 }
 0x365   : > { %v731_v11 = vadd.f32 %v730_v8, %v653_v9 }
 0x366   : > { %v732_v10 = vpop.f32.mrf.mxu1 }
 0x367   : > { %v733_v12 = vadd.f32 %v732_v10, %v653_v9 }
 0x369   : > { %v737_v13 = vcombine.low %v731_v11, %v733_v12 }
 0x36b   : > { %739 = vst [vmem:[%s360_s24] sm:$0x77] %v737_v13 }
 0x36c PF: > { %p15_p9 = scmp.ge.s32.totalorder %s946_s9, 4   ;;  %s1064_s27 = smov %s876_s28 }
 0x36d   : > { %s1065_s28 = smov %s955_s12  ;;  %s1066_s29 = smov %s946_s9 }
 0x36e   :  { %17 = sbr.rel (!%p15_p9) target bundleno = 2 (0x2), region = 110 }

</bundles_post_ra>
